<compile_context>
chip_gen: v7x
topology: tpu7x:2x2x1
jax: 0.10.0
libtpu: 0.0.40
codegen_flags: <defaults>
</compile_context>

<pallas_src>
import functools
import math

import jax
import jax.numpy as jnp
from jax import lax
from jax.experimental import pallas as pl
from jax.experimental.pallas import tpu as pltpu

# ---- small, module-consistent shapes -------------------------------------
B, S, H = 2, 8, 32          # batch, seq, hidden
NUM_HEADS = 2
HEAD_DIM = H // NUM_HEADS
FFN = 64
VOCAB = 64
LN_EPS = 1e-12
LANE = 128                  # lane-aligned segment stride in the packed slabs


# ---- Pallas kernel: all 3B sequences (embed + encoder block + pool) in one
# ---- grid step over a [3B*S, H] activation slab ---------------------------
def _sbert_kernel(ids_ref, tok_ref, pos_ref, bias_ref, wmat_ref, vec_ref,
                  out_ref, *, n_seq, seq, hidden, num_heads, ffn, vocab,
                  ln_eps, pooler):
    f32, bf16 = jnp.float32, jnp.bfloat16
    n = n_seq * seq                                    # total token rows (48)
    hd = hidden // num_heads

    # ---- token-embedding gather: one vectorized compare + one exact f32
    # ---- MXU matmul (no serial per-token loop) --------------------------------
    ids = ids_ref[...]                                             # [n, 1] int32
    col = lax.broadcasted_iota(jnp.int32, (n, vocab), 1)
    onehot = jnp.where(col == ids, 1.0, 0.0)                       # [n, V] f32
    x = jnp.dot(onehot, tok_ref[...], preferred_element_type=f32) + pos_ref[...]

    # ---- packed parameter slabs (segments start at 128-lane boundaries) -------
    w_qkv = wmat_ref[:, 0:3 * hidden]                  # bf16 [H, 3H]
    wo = wmat_ref[:, LANE:LANE + hidden]               # bf16 [H, H]
    w1 = wmat_ref[:, 2 * LANE:2 * LANE + ffn]          # bf16 [H, FFN]
    w2t = wmat_ref[:, 3 * LANE:3 * LANE + ffn]         # bf16 [H, FFN] == w2.T

    b_qkv = vec_ref[0:1, 0:3 * hidden]
    bo = vec_ref[1:2, 0:hidden]
    b1 = vec_ref[2:3, 0:ffn]
    b2 = vec_ref[3:4, 0:hidden]
    ln0_g = vec_ref[4:5, 0:hidden]
    ln0_b = vec_ref[5:6, 0:hidden]
    ln1_g = vec_ref[6:7, 0:hidden]
    ln1_b = vec_ref[7:8, 0:hidden]
    ln2_g = vec_ref[8:9, 0:hidden]
    ln2_b = vec_ref[9:10, 0:hidden]

    def layer_norm(v, g, b):
        mu = jnp.mean(v, axis=-1, keepdims=True)
        var = jnp.mean((v - mu) ** 2, axis=-1, keepdims=True)
        return (v - mu) * lax.rsqrt(var + ln_eps) * g + b

    h0 = layer_norm(x, ln0_g, ln0_b)                   # [n, H] f32
    h0b = h0.astype(bf16)                              # cast once, reuse

    # ---- fused QKV projection for ALL sequences in one MXU push (M = 48) ------
    qkv = jnp.dot(h0b, w_qkv, preferred_element_type=f32) + b_qkv   # [n, 3H]

    # ---- block-diagonal (per-sequence) multi-head self-attention --------------
    attn_bias = bias_ref[...]                          # [n, n] f32, 0 / -1e30
    scale = 1.0 / math.sqrt(hd)

    attn = jnp.zeros((n, hidden), f32)
    for hh in range(num_heads):                        # static unroll (2 heads)
        lo = hh * hd
        qh = qkv[:, lo:lo + hd].astype(bf16)
        kh = qkv[:, hidden + lo:hidden + lo + hd].astype(bf16)
        vh = qkv[:, 2 * hidden + lo:2 * hidden + lo + hd].astype(bf16)
        s = lax.dot_general(qh, kh, (((1,), (1,)), ((), ())),
                            preferred_element_type=f32) * scale     # [n, n]
        s = s + attn_bias                               # mask cross-sequence
        m = jnp.max(s, axis=-1, keepdims=True)
        e = jnp.exp(s - m)
        p = e / jnp.sum(e, axis=-1, keepdims=True)      # exact divide (parity)
        ctx = jnp.dot(p.astype(bf16), vh, preferred_element_type=f32)  # [n, hd]
        # fold directly into the output projection; no concat needed
        attn = attn + jnp.dot(ctx.astype(bf16), wo[lo:lo + hd, :],
                              preferred_element_type=f32)
    attn = attn + bo

    h1 = layer_norm(h0 + attn, ln1_g, ln1_b)

    # ---- feed-forward ----
    ff = jnp.dot(h1.astype(bf16), w1, preferred_element_type=f32) + b1
    ff = jax.nn.gelu(ff)  # TODO(synk): tanh approx; PyTorch nn.GELU default is exact erf
    ff = lax.dot_general(ff.astype(bf16), w2t, (((1,), (1,)), ((), ())),
                         preferred_element_type=f32) + b2
    h2 = layer_norm(h1 + ff, ln2_g, ln2_b)             # [n, H]

    # ---- _pool (faithful: 'mean' == MAX over tokens [1:-1]; else token 0) -----
    rows = lax.broadcasted_iota(jnp.int32, (seq, hidden), 0)
    valid = (rows >= 1) & (rows <= seq - 2)
    pooled_rows = []
    for r in range(n_seq):                             # static, sublane-aligned
        blk = h2[r * seq:(r + 1) * seq, :]             # [S, H]
        if pooler == "mean":
            pooled_rows.append(
                jnp.max(jnp.where(valid, blk, -jnp.inf), axis=0, keepdims=True))
        else:
            pooled_rows.append(blk[0:1, :])
    out_ref[...] = jnp.concatenate(pooled_rows, axis=0)  # single [3B, H] store


# ---- wrapper: pack params into lane-aligned slabs, one fused pallas_call ----
def _pack_params(params, num_seqs):
    def seg(w):
        w = jnp.asarray(w, jnp.float32)
        return jnp.pad(w, ((0, 0), (0, LANE - w.shape[1])))

    # matrix slab [H, 4*128] bf16: QKV | O | W1 | W2^T, each at a 128-lane start
    wmat = jnp.concatenate([
        seg(jnp.concatenate([params["wq"], params["wk"], params["wv"]], axis=1)),
        seg(params["wo"]),
        seg(params["w1"]),
        seg(params["w2"].T),
    ], axis=1).astype(jnp.bfloat16)

    def row(v):
        v = jnp.asarray(v, jnp.float32).reshape(1, -1)
        return jnp.pad(v, ((0, 0), (0, LANE - v.shape[1])))

    # bias / LayerNorm slab [10, 128] f32
    vec = jnp.concatenate([
        row(jnp.concatenate([params["bq"], params["bk"], params["bv"]], axis=1)),
        row(params["bo"]), row(params["b1"]), row(params["b2"]),
        row(params["ln0_g"]), row(params["ln0_b"]),
        row(params["ln1_g"]), row(params["ln1_b"]),
        row(params["ln2_g"]), row(params["ln2_b"]),
    ], axis=0)

    tok_tab = params["tok_emb"].astype(jnp.float32)                 # [V, H]
    # seg_ids are all zeros in forward(), so fold seg row 0 into the pos rows
    posseg = (params["pos_emb"] + params["seg_emb"][0][None, :]).astype(jnp.float32)
    pos_tiled = jnp.tile(posseg, (num_seqs, 1))                     # [3B*S, H]
    return tok_tab, pos_tiled, wmat, vec


def encode_and_pool(ids_all, tok_tab, pos_tiled, wmat, vec, pooler="mean"):
    r, s = ids_all.shape                                            # [3B, S]
    vocab, hid = tok_tab.shape
    n = r * s

    ids2d = ids_all.reshape(n, 1).astype(jnp.int32)
    # block-diagonal additive attention bias (per-sequence attention)
    blk_ids = jnp.arange(n, dtype=jnp.int32) // s
    attn_bias = jnp.where(blk_ids[:, None] == blk_ids[None, :],
                          0.0, -1e30).astype(jnp.float32)           # [n, n]

    kern = functools.partial(
        _sbert_kernel, n_seq=r, seq=s, hidden=hid, num_heads=NUM_HEADS,
        ffn=FFN, vocab=vocab, ln_eps=LN_EPS, pooler=pooler)

    # Single grid step: all sequences share the same matmuls (overhead-bound
    # regime; 6 -> 1 pipeline steps).  A 2-step split for v7x's two TensorCores
    # would only need the output restructured into 8-row blocks.
    pooled = pl.pallas_call(
        kern,
        out_shape=jax.ShapeDtypeStruct((r, hid), jnp.float32),
        grid_spec=pltpu.PrefetchScalarGridSpec(
            num_scalar_prefetch=0,
            grid=(1,),
            in_specs=[
                pl.BlockSpec(ids2d.shape, lambda i: (0, 0)),        # token ids
                pl.BlockSpec(tok_tab.shape, lambda i: (0, 0)),      # embed table
                pl.BlockSpec(pos_tiled.shape, lambda i: (0, 0)),    # pos+seg rows
                pl.BlockSpec(attn_bias.shape, lambda i: (0, 0)),    # block-diag bias
                pl.BlockSpec(wmat.shape, lambda i: (0, 0)),         # weight slab
                pl.BlockSpec(vec.shape, lambda i: (0, 0)),          # bias/LN slab
            ],
            out_specs=pl.BlockSpec((r, hid), lambda i: (0, 0)),
        ),
        compiler_params=pltpu.CompilerParams(
            dimension_semantics=("arbitrary",)),
    )(ids2d, tok_tab, pos_tiled, attn_bias, wmat, vec)
    return pooled                                                   # [3B, H]


def sbert_forward(a, p, n, params, pooler="mean"):
    bsz = a.shape[0]
    ids_all = jnp.concatenate([a, p, n], axis=0)      # [3B, S] — one kernel call
    tok_tab, pos_tiled, wmat, vec = _pack_params(params, ids_all.shape[0])
    pooled = encode_and_pool(ids_all, tok_tab, pos_tiled, wmat, vec, pooler)
    return pooled[:bsz], pooled[bsz:2 * bsz], pooled[2 * bsz:]


# ---- deterministic parameter init ------------------------------------------
def init_params(key):
    keys = jax.random.split(key, 9)

    def nrm(k, shape, scale=0.02):
        return (scale * jax.random.normal(k, shape)).astype(jnp.float32)

    ones = lambda shp: jnp.ones(shp, jnp.float32)
    zeros = lambda shp: jnp.zeros(shp, jnp.float32)

    return dict(
        tok_emb=nrm(keys[0], (VOCAB, H)),
        seg_emb=nrm(keys[1], (2, H)),
        pos_emb=nrm(keys[2], (S, H)),
        ln0_g=ones((1, H)), ln0_b=zeros((1, H)),
        wq=nrm(keys[3], (H, H)), bq=zeros((1, H)),
        wk=nrm(keys[4], (H, H)), bk=zeros((1, H)),
        wv=nrm(keys[5], (H, H)), bv=zeros((1, H)),
        wo=nrm(keys[6], (H, H)), bo=zeros((1, H)),
        ln1_g=ones((1, H)), ln1_b=zeros((1, H)),
        w1=nrm(keys[7], (H, FFN)), b1=zeros((1, FFN)),
        w2=nrm(keys[8], (FFN, H)), b2=zeros((1, H)),
        ln2_g=ones((1, H)), ln2_b=zeros((1, H)),
    )


if __name__ == "__main__":
    key = jax.random.PRNGKey(0)
    pk, ka, kp, kn = jax.random.split(key, 4)
    params = init_params(pk)

    a = jax.random.randint(ka, (B, S), 0, VOCAB, dtype=jnp.int32)
    p = jax.random.randint(kp, (B, S), 0, VOCAB, dtype=jnp.int32)
    n = jax.random.randint(kn, (B, S), 0, VOCAB, dtype=jnp.int32)

    out = jax.jit(sbert_forward)(a, p, n, params)
    jax.block_until_ready(out)
    assert len(out) == 3 and all(o.shape == (B, H) for o in out)
    print("KERNEL_OK")
</pallas_src>

<mosaic_0001>
module attributes {stable_mosaic.version = 11 : i64} {
  func.func @_sbert_kernel(%arg0: i32, %arg1: memref<48x1xi32, #tpu.memory_space<vmem>>, %arg2: memref<64x32xf32, #tpu.memory_space<vmem>>, %arg3: memref<48x32xf32, #tpu.memory_space<vmem>>, %arg4: memref<48x48xf32, #tpu.memory_space<vmem>>, %arg5: memref<32x512xbf16, #tpu.memory_space<vmem>>, %arg6: memref<10x128xf32, #tpu.memory_space<vmem>>, %arg7: memref<6x32xf32, #tpu.memory_space<vmem>>) attributes {dimension_semantics = [#tpu.dimension_semantics<arbitrary>], iteration_bounds = array<i64: 1>, scalar_prefetch = 0 : i64, scratch_operands = 0 : i64, tpu.core_type = #tpu.core_type<tc>, window_params = [{pipeline_mode = #tpu.pipeline_mode<synchronous>, transform_indices = @transform_0, window_bounds = array<i64: 48, 1>}, {pipeline_mode = #tpu.pipeline_mode<synchronous>, transform_indices = @transform_1, window_bounds = array<i64: 64, 32>}, {pipeline_mode = #tpu.pipeline_mode<synchronous>, transform_indices = @transform_2, window_bounds = array<i64: 48, 32>}, {pipeline_mode = #tpu.pipeline_mode<synchronous>, transform_indices = @transform_3, window_bounds = array<i64: 48, 48>}, {pipeline_mode = #tpu.pipeline_mode<synchronous>, transform_indices = @transform_4, window_bounds = array<i64: 32, 512>}, {pipeline_mode = #tpu.pipeline_mode<synchronous>, transform_indices = @transform_5, window_bounds = array<i64: 10, 128>}, {pipeline_mode = #tpu.pipeline_mode<synchronous>, transform_indices = @transform_6, window_bounds = array<i64: 6, 32>}]} {
    %c0 = arith.constant 0 : index
    %c0_0 = arith.constant 0 : index
    %0 = vector.load %arg1[%c0, %c0_0] : memref<48x1xi32, #tpu.memory_space<vmem>>, vector<48x1xi32>
    %1 = tpu.iota {dimensions = array<i32: 1>} : vector<48x64xi32>
    %2 = vector.broadcast %0 : vector<48x1xi32> to vector<48x64xi32>
    %3 = arith.cmpi eq, %1, %2 : vector<48x64xi32>
    %cst = arith.constant 1.000000e+00 : f32
    %cst_1 = arith.constant 0.000000e+00 : f32
    %4 = vector.broadcast %cst : f32 to vector<48x64xf32>
    %5 = vector.broadcast %cst_1 : f32 to vector<48x64xf32>
    %6 = arith.select %3, %4, %5 : vector<48x64xi1>, vector<48x64xf32>
    %c0_2 = arith.constant 0 : index
    %c0_3 = arith.constant 0 : index
    %7 = vector.load %arg2[%c0_2, %c0_3] : memref<64x32xf32, #tpu.memory_space<vmem>>, vector<64x32xf32>
    %cst_4 = arith.constant dense<0.000000e+00> : vector<48x32xf32>
    %8 = tpu.matmul %6, %7, %cst_4 {dimension_numbers = #tpu.dot_dimension_numbers<[1], [0], [0], [1], [0, 0, 1, 1], [], []>} : vector<48x64xf32>, vector<64x32xf32>, vector<48x32xf32> -> vector<48x32xf32>
    %c0_5 = arith.constant 0 : index
    %c0_6 = arith.constant 0 : index
    %9 = vector.load %arg3[%c0_5, %c0_6] : memref<48x32xf32, #tpu.memory_space<vmem>>, vector<48x32xf32>
    %10 = arith.addf %8, %9 : vector<48x32xf32>
    %c0_7 = arith.constant 0 : index
    %c0_8 = arith.constant 0 : index
    %11 = vector.load %arg5[%c0_7, %c0_8] : memref<32x512xbf16, #tpu.memory_space<vmem>>, vector<32x96xbf16>
    %c0_9 = arith.constant 0 : index
    %c128 = arith.constant 128 : index
    %12 = vector.load %arg5[%c0_9, %c128] : memref<32x512xbf16, #tpu.memory_space<vmem>>, vector<32x32xbf16>
    %c0_10 = arith.constant 0 : index
    %c256 = arith.constant 256 : index
    %13 = vector.load %arg5[%c0_10, %c256] : memref<32x512xbf16, #tpu.memory_space<vmem>>, vector<32x64xbf16>
    %c0_11 = arith.constant 0 : index
    %c384 = arith.constant 384 : index
    %14 = vector.load %arg5[%c0_11, %c384] : memref<32x512xbf16, #tpu.memory_space<vmem>>, vector<32x64xbf16>
    %c0_12 = arith.constant 0 : index
    %c0_13 = arith.constant 0 : index
    %15 = vector.load %arg6[%c0_12, %c0_13] : memref<10x128xf32, #tpu.memory_space<vmem>>, vector<1x96xf32>
    %c1 = arith.constant 1 : index
    %c0_14 = arith.constant 0 : index
    %16 = vector.load %arg6[%c1, %c0_14] : memref<10x128xf32, #tpu.memory_space<vmem>>, vector<1x32xf32>
    %c2 = arith.constant 2 : index
    %c0_15 = arith.constant 0 : index
    %17 = vector.load %arg6[%c2, %c0_15] : memref<10x128xf32, #tpu.memory_space<vmem>>, vector<1x64xf32>
    %c3 = arith.constant 3 : index
    %c0_16 = arith.constant 0 : index
    %18 = vector.load %arg6[%c3, %c0_16] : memref<10x128xf32, #tpu.memory_space<vmem>>, vector<1x32xf32>
    %c4 = arith.constant 4 : index
    %c0_17 = arith.constant 0 : index
    %19 = vector.load %arg6[%c4, %c0_17] : memref<10x128xf32, #tpu.memory_space<vmem>>, vector<1x32xf32>
    %c5 = arith.constant 5 : index
    %c0_18 = arith.constant 0 : index
    %20 = vector.load %arg6[%c5, %c0_18] : memref<10x128xf32, #tpu.memory_space<vmem>>, vector<1x32xf32>
    %c6 = arith.constant 6 : index
    %c0_19 = arith.constant 0 : index
    %21 = vector.load %arg6[%c6, %c0_19] : memref<10x128xf32, #tpu.memory_space<vmem>>, vector<1x32xf32>
    %c7 = arith.constant 7 : index
    %c0_20 = arith.constant 0 : index
    %22 = vector.load %arg6[%c7, %c0_20] : memref<10x128xf32, #tpu.memory_space<vmem>>, vector<1x32xf32>
    %c8 = arith.constant 8 : index
    %c0_21 = arith.constant 0 : index
    %23 = vector.load %arg6[%c8, %c0_21] : memref<10x128xf32, #tpu.memory_space<vmem>>, vector<1x32xf32>
    %c9 = arith.constant 9 : index
    %c0_22 = arith.constant 0 : index
    %24 = vector.load %arg6[%c9, %c0_22] : memref<10x128xf32, #tpu.memory_space<vmem>>, vector<1x32xf32>
    %cst_23 = arith.constant dense<0.000000e+00> : vector<48xf32>
    %25 = vector.multi_reduction <add>, %10, %cst_23 [1] : vector<48x32xf32> to vector<48xf32>
    %26 = vector.shape_cast %25 : vector<48xf32> to vector<48x1xf32>
    %cst_24 = arith.constant 3.200000e+01 : f32
    %27 = vector.broadcast %cst_24 : f32 to vector<48x1xf32>
    %28 = arith.divf %26, %27 : vector<48x1xf32>
    %29 = vector.broadcast %28 : vector<48x1xf32> to vector<48x32xf32>
    %30 = arith.subf %10, %29 : vector<48x32xf32>
    %31 = arith.mulf %30, %30 : vector<48x32xf32>
    %cst_25 = arith.constant dense<0.000000e+00> : vector<48xf32>
    %32 = vector.multi_reduction <add>, %31, %cst_25 [1] : vector<48x32xf32> to vector<48xf32>
    %33 = vector.shape_cast %32 : vector<48xf32> to vector<48x1xf32>
    %cst_26 = arith.constant 3.200000e+01 : f32
    %34 = vector.broadcast %cst_26 : f32 to vector<48x1xf32>
    %35 = arith.divf %33, %34 : vector<48x1xf32>
    %36 = vector.broadcast %28 : vector<48x1xf32> to vector<48x32xf32>
    %37 = arith.subf %10, %36 : vector<48x32xf32>
    %cst_27 = arith.constant 9.99999996E-13 : f32
    %38 = vector.broadcast %cst_27 : f32 to vector<48x1xf32>
    %39 = arith.addf %35, %38 : vector<48x1xf32>
    %40 = math.rsqrt %39 : vector<48x1xf32>
    %41 = vector.broadcast %40 : vector<48x1xf32> to vector<48x32xf32>
    %42 = arith.mulf %37, %41 : vector<48x32xf32>
    %43 = vector.broadcast %19 : vector<1x32xf32> to vector<48x32xf32>
    %44 = arith.mulf %42, %43 : vector<48x32xf32>
    %45 = vector.broadcast %20 : vector<1x32xf32> to vector<48x32xf32>
    %46 = arith.addf %44, %45 : vector<48x32xf32>
    %47 = arith.truncf %46 : vector<48x32xf32> to vector<48x32xbf16>
    %cst_28 = arith.constant dense<0.000000e+00> : vector<48x96xf32>
    %48 = tpu.matmul %47, %11, %cst_28 {dimension_numbers = #tpu.dot_dimension_numbers<[1], [0], [0], [1], [0, 0, 1, 1], [], []>} : vector<48x32xbf16>, vector<32x96xbf16>, vector<48x96xf32> -> vector<48x96xf32>
    %49 = vector.broadcast %15 : vector<1x96xf32> to vector<48x96xf32>
    %50 = arith.addf %48, %49 : vector<48x96xf32>
    %c0_29 = arith.constant 0 : index
    %c0_30 = arith.constant 0 : index
    %51 = vector.load %arg4[%c0_29, %c0_30] : memref<48x48xf32, #tpu.memory_space<vmem>>, vector<48x48xf32>
    %cst_31 = arith.constant 0.000000e+00 : f32
    %52 = vector.broadcast %cst_31 : f32 to vector<48x32xf32>
    %53 = vector.extract_strided_slice %50 {offsets = [0, 0], sizes = [48, 16], strides = [1, 1]} : vector<48x96xf32> to vector<48x16xf32>
    %54 = arith.truncf %53 : vector<48x16xf32> to vector<48x16xbf16>
    %55 = vector.extract_strided_slice %50 {offsets = [0, 32], sizes = [48, 16], strides = [1, 1]} : vector<48x96xf32> to vector<48x16xf32>
    %56 = arith.truncf %55 : vector<48x16xf32> to vector<48x16xbf16>
    %57 = vector.extract_strided_slice %50 {offsets = [0, 64], sizes = [48, 16], strides = [1, 1]} : vector<48x96xf32> to vector<48x16xf32>
    %58 = arith.truncf %57 : vector<48x16xf32> to vector<48x16xbf16>
    %cst_32 = arith.constant dense<0.000000e+00> : vector<48x48xf32>
    %59 = tpu.matmul %54, %56, %cst_32 {dimension_numbers = #tpu.dot_dimension_numbers<[1], [1], [0], [0], [0, 0, 1, 0], [], []>} : vector<48x16xbf16>, vector<48x16xbf16>, vector<48x48xf32> -> vector<48x48xf32>
    %cst_33 = arith.constant 2.500000e-01 : f32
    %60 = vector.broadcast %cst_33 : f32 to vector<48x48xf32>
    %61 = arith.mulf %59, %60 : vector<48x48xf32>
    %62 = arith.addf %61, %51 : vector<48x48xf32>
    %cst_34 = arith.constant dense<0xFF800000> : vector<48xf32>
    %63 = vector.multi_reduction <maximumf>, %62, %cst_34 [1] : vector<48x48xf32> to vector<48xf32>
    %64 = vector.shape_cast %63 : vector<48xf32> to vector<48x1xf32>
    %65 = vector.broadcast %64 : vector<48x1xf32> to vector<48x48xf32>
    %66 = arith.subf %62, %65 : vector<48x48xf32>
    %67 = math.exp %66 : vector<48x48xf32>
    %cst_35 = arith.constant dense<0.000000e+00> : vector<48xf32>
    %68 = vector.multi_reduction <add>, %67, %cst_35 [1] : vector<48x48xf32> to vector<48xf32>
    %69 = vector.shape_cast %68 : vector<48xf32> to vector<48x1xf32>
    %70 = vector.broadcast %69 : vector<48x1xf32> to vector<48x48xf32>
    %71 = arith.divf %67, %70 : vector<48x48xf32>
    %72 = arith.truncf %71 : vector<48x48xf32> to vector<48x48xbf16>
    %cst_36 = arith.constant dense<0.000000e+00> : vector<48x16xf32>
    %73 = tpu.matmul %72, %58, %cst_36 {dimension_numbers = #tpu.dot_dimension_numbers<[1], [0], [0], [1], [0, 0, 1, 1], [], []>} : vector<48x48xbf16>, vector<48x16xbf16>, vector<48x16xf32> -> vector<48x16xf32>
    %74 = arith.truncf %73 : vector<48x16xf32> to vector<48x16xbf16>
    %75 = vector.extract_strided_slice %12 {offsets = [0, 0], sizes = [16, 32], strides = [1, 1]} : vector<32x32xbf16> to vector<16x32xbf16>
    %cst_37 = arith.constant dense<0.000000e+00> : vector<48x32xf32>
    %76 = tpu.matmul %74, %75, %cst_37 {dimension_numbers = #tpu.dot_dimension_numbers<[1], [0], [0], [1], [0, 0, 1, 1], [], []>} : vector<48x16xbf16>, vector<16x32xbf16>, vector<48x32xf32> -> vector<48x32xf32>
    %77 = arith.addf %52, %76 : vector<48x32xf32>
    %78 = vector.extract_strided_slice %50 {offsets = [0, 16], sizes = [48, 16], strides = [1, 1]} : vector<48x96xf32> to vector<48x16xf32>
    %79 = arith.truncf %78 : vector<48x16xf32> to vector<48x16xbf16>
    %80 = vector.extract_strided_slice %50 {offsets = [0, 48], sizes = [48, 16], strides = [1, 1]} : vector<48x96xf32> to vector<48x16xf32>
    %81 = arith.truncf %80 : vector<48x16xf32> to vector<48x16xbf16>
    %82 = vector.extract_strided_slice %50 {offsets = [0, 80], sizes = [48, 16], strides = [1, 1]} : vector<48x96xf32> to vector<48x16xf32>
    %83 = arith.truncf %82 : vector<48x16xf32> to vector<48x16xbf16>
    %cst_38 = arith.constant dense<0.000000e+00> : vector<48x48xf32>
    %84 = tpu.matmul %79, %81, %cst_38 {dimension_numbers = #tpu.dot_dimension_numbers<[1], [1], [0], [0], [0, 0, 1, 0], [], []>} : vector<48x16xbf16>, vector<48x16xbf16>, vector<48x48xf32> -> vector<48x48xf32>
    %cst_39 = arith.constant 2.500000e-01 : f32
    %85 = vector.broadcast %cst_39 : f32 to vector<48x48xf32>
    %86 = arith.mulf %84, %85 : vector<48x48xf32>
    %87 = arith.addf %86, %51 : vector<48x48xf32>
    %cst_40 = arith.constant dense<0xFF800000> : vector<48xf32>
    %88 = vector.multi_reduction <maximumf>, %87, %cst_40 [1] : vector<48x48xf32> to vector<48xf32>
    %89 = vector.shape_cast %88 : vector<48xf32> to vector<48x1xf32>
    %90 = vector.broadcast %89 : vector<48x1xf32> to vector<48x48xf32>
    %91 = arith.subf %87, %90 : vector<48x48xf32>
    %92 = math.exp %91 : vector<48x48xf32>
    %cst_41 = arith.constant dense<0.000000e+00> : vector<48xf32>
    %93 = vector.multi_reduction <add>, %92, %cst_41 [1] : vector<48x48xf32> to vector<48xf32>
    %94 = vector.shape_cast %93 : vector<48xf32> to vector<48x1xf32>
    %95 = vector.broadcast %94 : vector<48x1xf32> to vector<48x48xf32>
    %96 = arith.divf %92, %95 : vector<48x48xf32>
    %97 = arith.truncf %96 : vector<48x48xf32> to vector<48x48xbf16>
    %cst_42 = arith.constant dense<0.000000e+00> : vector<48x16xf32>
    %98 = tpu.matmul %97, %83, %cst_42 {dimension_numbers = #tpu.dot_dimension_numbers<[1], [0], [0], [1], [0, 0, 1, 1], [], []>} : vector<48x48xbf16>, vector<48x16xbf16>, vector<48x16xf32> -> vector<48x16xf32>
    %99 = arith.truncf %98 : vector<48x16xf32> to vector<48x16xbf16>
    %100 = vector.extract_strided_slice %12 {offsets = [16, 0], sizes = [16, 32], strides = [1, 1]} : vector<32x32xbf16> to vector<16x32xbf16>
    %cst_43 = arith.constant dense<0.000000e+00> : vector<48x32xf32>
    %101 = tpu.matmul %99, %100, %cst_43 {dimension_numbers = #tpu.dot_dimension_numbers<[1], [0], [0], [1], [0, 0, 1, 1], [], []>} : vector<48x16xbf16>, vector<16x32xbf16>, vector<48x32xf32> -> vector<48x32xf32>
    %102 = arith.addf %77, %101 : vector<48x32xf32>
    %103 = vector.broadcast %16 : vector<1x32xf32> to vector<48x32xf32>
    %104 = arith.addf %102, %103 : vector<48x32xf32>
    %105 = arith.addf %46, %104 : vector<48x32xf32>
    %cst_44 = arith.constant dense<0.000000e+00> : vector<48xf32>
    %106 = vector.multi_reduction <add>, %105, %cst_44 [1] : vector<48x32xf32> to vector<48xf32>
    %107 = vector.shape_cast %106 : vector<48xf32> to vector<48x1xf32>
    %cst_45 = arith.constant 3.200000e+01 : f32
    %108 = vector.broadcast %cst_45 : f32 to vector<48x1xf32>
    %109 = arith.divf %107, %108 : vector<48x1xf32>
    %110 = vector.broadcast %109 : vector<48x1xf32> to vector<48x32xf32>
    %111 = arith.subf %105, %110 : vector<48x32xf32>
    %112 = arith.mulf %111, %111 : vector<48x32xf32>
    %cst_46 = arith.constant dense<0.000000e+00> : vector<48xf32>
    %113 = vector.multi_reduction <add>, %112, %cst_46 [1] : vector<48x32xf32> to vector<48xf32>
    %114 = vector.shape_cast %113 : vector<48xf32> to vector<48x1xf32>
    %cst_47 = arith.constant 3.200000e+01 : f32
    %115 = vector.broadcast %cst_47 : f32 to vector<48x1xf32>
    %116 = arith.divf %114, %115 : vector<48x1xf32>
    %117 = vector.broadcast %109 : vector<48x1xf32> to vector<48x32xf32>
    %118 = arith.subf %105, %117 : vector<48x32xf32>
    %cst_48 = arith.constant 9.99999996E-13 : f32
    %119 = vector.broadcast %cst_48 : f32 to vector<48x1xf32>
    %120 = arith.addf %116, %119 : vector<48x1xf32>
    %121 = math.rsqrt %120 : vector<48x1xf32>
    %122 = vector.broadcast %121 : vector<48x1xf32> to vector<48x32xf32>
    %123 = arith.mulf %118, %122 : vector<48x32xf32>
    %124 = vector.broadcast %21 : vector<1x32xf32> to vector<48x32xf32>
    %125 = arith.mulf %123, %124 : vector<48x32xf32>
    %126 = vector.broadcast %22 : vector<1x32xf32> to vector<48x32xf32>
    %127 = arith.addf %125, %126 : vector<48x32xf32>
    %128 = arith.truncf %127 : vector<48x32xf32> to vector<48x32xbf16>
    %cst_49 = arith.constant dense<0.000000e+00> : vector<48x64xf32>
    %129 = tpu.matmul %128, %13, %cst_49 {dimension_numbers = #tpu.dot_dimension_numbers<[1], [0], [0], [1], [0, 0, 1, 1], [], []>} : vector<48x32xbf16>, vector<32x64xbf16>, vector<48x64xf32> -> vector<48x64xf32>
    %130 = vector.broadcast %17 : vector<1x64xf32> to vector<48x64xf32>
    %131 = arith.addf %129, %130 : vector<48x64xf32>
    %132 = arith.mulf %131, %131 : vector<48x64xf32>
    %133 = arith.mulf %131, %132 : vector<48x64xf32>
    %cst_50 = arith.constant 4.471500e-02 : f32
    %134 = vector.broadcast %cst_50 : f32 to vector<48x64xf32>
    %135 = arith.mulf %134, %133 : vector<48x64xf32>
    %136 = arith.addf %131, %135 : vector<48x64xf32>
    %cst_51 = arith.constant 0.797884583 : f32
    %137 = vector.broadcast %cst_51 : f32 to vector<48x64xf32>
    %138 = arith.mulf %137, %136 : vector<48x64xf32>
    %139 = math.tanh %138 : vector<48x64xf32>
    %cst_52 = arith.constant 1.000000e+00 : f32
    %140 = vector.broadcast %cst_52 : f32 to vector<48x64xf32>
    %141 = arith.addf %140, %139 : vector<48x64xf32>
    %cst_53 = arith.constant 5.000000e-01 : f32
    %142 = vector.broadcast %cst_53 : f32 to vector<48x64xf32>
    %143 = arith.mulf %142, %141 : vector<48x64xf32>
    %144 = arith.mulf %131, %143 : vector<48x64xf32>
    %145 = arith.truncf %144 : vector<48x64xf32> to vector<48x64xbf16>
    %cst_54 = arith.constant dense<0.000000e+00> : vector<48x32xf32>
    %146 = tpu.matmul %145, %14, %cst_54 {dimension_numbers = #tpu.dot_dimension_numbers<[1], [1], [0], [0], [0, 0, 1, 0], [], []>} : vector<48x64xbf16>, vector<32x64xbf16>, vector<48x32xf32> -> vector<48x32xf32>
    %147 = vector.broadcast %18 : vector<1x32xf32> to vector<48x32xf32>
    %148 = arith.addf %146, %147 : vector<48x32xf32>
    %149 = arith.addf %127, %148 : vector<48x32xf32>
    %cst_55 = arith.constant dense<0.000000e+00> : vector<48xf32>
    %150 = vector.multi_reduction <add>, %149, %cst_55 [1] : vector<48x32xf32> to vector<48xf32>
    %151 = vector.shape_cast %150 : vector<48xf32> to vector<48x1xf32>
    %cst_56 = arith.constant 3.200000e+01 : f32
    %152 = vector.broadcast %cst_56 : f32 to vector<48x1xf32>
    %153 = arith.divf %151, %152 : vector<48x1xf32>
    %154 = vector.broadcast %153 : vector<48x1xf32> to vector<48x32xf32>
    %155 = arith.subf %149, %154 : vector<48x32xf32>
    %156 = arith.mulf %155, %155 : vector<48x32xf32>
    %cst_57 = arith.constant dense<0.000000e+00> : vector<48xf32>
    %157 = vector.multi_reduction <add>, %156, %cst_57 [1] : vector<48x32xf32> to vector<48xf32>
    %158 = vector.shape_cast %157 : vector<48xf32> to vector<48x1xf32>
    %cst_58 = arith.constant 3.200000e+01 : f32
    %159 = vector.broadcast %cst_58 : f32 to vector<48x1xf32>
    %160 = arith.divf %158, %159 : vector<48x1xf32>
    %161 = vector.broadcast %153 : vector<48x1xf32> to vector<48x32xf32>
    %162 = arith.subf %149, %161 : vector<48x32xf32>
    %cst_59 = arith.constant 9.99999996E-13 : f32
    %163 = vector.broadcast %cst_59 : f32 to vector<48x1xf32>
    %164 = arith.addf %160, %163 : vector<48x1xf32>
    %165 = math.rsqrt %164 : vector<48x1xf32>
    %166 = vector.broadcast %165 : vector<48x1xf32> to vector<48x32xf32>
    %167 = arith.mulf %162, %166 : vector<48x32xf32>
    %168 = vector.broadcast %23 : vector<1x32xf32> to vector<48x32xf32>
    %169 = arith.mulf %167, %168 : vector<48x32xf32>
    %170 = vector.broadcast %24 : vector<1x32xf32> to vector<48x32xf32>
    %171 = arith.addf %169, %170 : vector<48x32xf32>
    %172 = tpu.iota {dimensions = array<i32: 0>} : vector<8x32xi32>
    %c1_i32 = arith.constant 1 : i32
    %173 = vector.broadcast %c1_i32 : i32 to vector<8x32xi32>
    %174 = arith.cmpi sge, %172, %173 : vector<8x32xi32>
    %c6_i32 = arith.constant 6 : i32
    %175 = vector.broadcast %c6_i32 : i32 to vector<8x32xi32>
    %176 = arith.cmpi sle, %172, %175 : vector<8x32xi32>
    %177 = arith.andi %174, %176 : vector<8x32xi1>
    %178 = vector.extract_strided_slice %171 {offsets = [0, 0], sizes = [8, 32], strides = [1, 1]} : vector<48x32xf32> to vector<8x32xf32>
    %cst_60 = arith.constant 0xFF800000 : f32
    %179 = vector.broadcast %cst_60 : f32 to vector<8x32xf32>
    %180 = arith.select %177, %178, %179 : vector<8x32xi1>, vector<8x32xf32>
    %cst_61 = arith.constant dense<0xFF800000> : vector<32xf32>
    %181 = vector.multi_reduction <maximumf>, %180, %cst_61 [0] : vector<8x32xf32> to vector<32xf32>
    %182 = vector.shape_cast %181 : vector<32xf32> to vector<1x32xf32>
    %183 = vector.extract_strided_slice %171 {offsets = [8, 0], sizes = [8, 32], strides = [1, 1]} : vector<48x32xf32> to vector<8x32xf32>
    %cst_62 = arith.constant 0xFF800000 : f32
    %184 = vector.broadcast %cst_62 : f32 to vector<8x32xf32>
    %185 = arith.select %177, %183, %184 : vector<8x32xi1>, vector<8x32xf32>
    %cst_63 = arith.constant dense<0xFF800000> : vector<32xf32>
    %186 = vector.multi_reduction <maximumf>, %185, %cst_63 [0] : vector<8x32xf32> to vector<32xf32>
    %187 = vector.shape_cast %186 : vector<32xf32> to vector<1x32xf32>
    %188 = vector.extract_strided_slice %171 {offsets = [16, 0], sizes = [8, 32], strides = [1, 1]} : vector<48x32xf32> to vector<8x32xf32>
    %cst_64 = arith.constant 0xFF800000 : f32
    %189 = vector.broadcast %cst_64 : f32 to vector<8x32xf32>
    %190 = arith.select %177, %188, %189 : vector<8x32xi1>, vector<8x32xf32>
    %cst_65 = arith.constant dense<0xFF800000> : vector<32xf32>
    %191 = vector.multi_reduction <maximumf>, %190, %cst_65 [0] : vector<8x32xf32> to vector<32xf32>
    %192 = vector.shape_cast %191 : vector<32xf32> to vector<1x32xf32>
    %193 = vector.extract_strided_slice %171 {offsets = [24, 0], sizes = [8, 32], strides = [1, 1]} : vector<48x32xf32> to vector<8x32xf32>
    %cst_66 = arith.constant 0xFF800000 : f32
    %194 = vector.broadcast %cst_66 : f32 to vector<8x32xf32>
    %195 = arith.select %177, %193, %194 : vector<8x32xi1>, vector<8x32xf32>
    %cst_67 = arith.constant dense<0xFF800000> : vector<32xf32>
    %196 = vector.multi_reduction <maximumf>, %195, %cst_67 [0] : vector<8x32xf32> to vector<32xf32>
    %197 = vector.shape_cast %196 : vector<32xf32> to vector<1x32xf32>
    %198 = vector.extract_strided_slice %171 {offsets = [32, 0], sizes = [8, 32], strides = [1, 1]} : vector<48x32xf32> to vector<8x32xf32>
    %cst_68 = arith.constant 0xFF800000 : f32
    %199 = vector.broadcast %cst_68 : f32 to vector<8x32xf32>
    %200 = arith.select %177, %198, %199 : vector<8x32xi1>, vector<8x32xf32>
    %cst_69 = arith.constant dense<0xFF800000> : vector<32xf32>
    %201 = vector.multi_reduction <maximumf>, %200, %cst_69 [0] : vector<8x32xf32> to vector<32xf32>
    %202 = vector.shape_cast %201 : vector<32xf32> to vector<1x32xf32>
    %203 = vector.extract_strided_slice %171 {offsets = [40, 0], sizes = [8, 32], strides = [1, 1]} : vector<48x32xf32> to vector<8x32xf32>
    %cst_70 = arith.constant 0xFF800000 : f32
    %204 = vector.broadcast %cst_70 : f32 to vector<8x32xf32>
    %205 = arith.select %177, %203, %204 : vector<8x32xi1>, vector<8x32xf32>
    %cst_71 = arith.constant dense<0xFF800000> : vector<32xf32>
    %206 = vector.multi_reduction <maximumf>, %205, %cst_71 [0] : vector<8x32xf32> to vector<32xf32>
    %207 = vector.shape_cast %206 : vector<32xf32> to vector<1x32xf32>
    %208 = tpu.concatenate %182, %187, %192, %197, %202, %207 in 0 : vector<1x32xf32>, vector<1x32xf32>, vector<1x32xf32>, vector<1x32xf32>, vector<1x32xf32>, vector<1x32xf32> -> vector<6x32xf32>
    %c0_72 = arith.constant 0 : index
    %c0_73 = arith.constant 0 : index
    %209 = vector.load %arg7[%c0_72, %c0_73] : memref<6x32xf32, #tpu.memory_space<vmem>>, vector<6x32xf32>
    tpu.vector_store %arg7[%c0_72, %c0_73], %208 {strides = array<i32>} : memref<6x32xf32, #tpu.memory_space<vmem>>, vector<6x32xf32>,
    return
  }
  func.func @transform_0(%arg0: i32) -> (i32, i32) {
    %c0_i32 = arith.constant 0 : i32
    %c0_i32_0 = arith.constant 0 : i32
    %c0_i32_1 = arith.constant 0 : i32
    return %c0_i32, %c0_i32_0 : i32, i32
  }
  func.func @transform_1(%arg0: i32) -> (i32, i32) {
    %c0_i32 = arith.constant 0 : i32
    %c0_i32_0 = arith.constant 0 : i32
    %c0_i32_1 = arith.constant 0 : i32
    return %c0_i32, %c0_i32_0 : i32, i32
  }
  func.func @transform_2(%arg0: i32) -> (i32, i32) {
    %c0_i32 = arith.constant 0 : i32
    %c0_i32_0 = arith.constant 0 : i32
    %c0_i32_1 = arith.constant 0 : i32
    return %c0_i32, %c0_i32_0 : i32, i32
  }
  func.func @transform_3(%arg0: i32) -> (i32, i32) {
    %c0_i32 = arith.constant 0 : i32
    %c0_i32_0 = arith.constant 0 : i32
    %c0_i32_1 = arith.constant 0 : i32
    return %c0_i32, %c0_i32_0 : i32, i32
  }
  func.func @transform_4(%arg0: i32) -> (i32, i32) {
    %c0_i32 = arith.constant 0 : i32
    %c0_i32_0 = arith.constant 0 : i32
    %c0_i32_1 = arith.constant 0 : i32
    return %c0_i32, %c0_i32_0 : i32, i32
  }
  func.func @transform_5(%arg0: i32) -> (i32, i32) {
    %c0_i32 = arith.constant 0 : i32
    %c0_i32_0 = arith.constant 0 : i32
    %c0_i32_1 = arith.constant 0 : i32
    return %c0_i32, %c0_i32_0 : i32, i32
  }
  func.func @transform_6(%arg0: i32) -> (i32, i32) {
    %c0_i32 = arith.constant 0 : i32
    %c0_i32_0 = arith.constant 0 : i32
    %c0_i32_1 = arith.constant 0 : i32
    return %c0_i32, %c0_i32_0 : i32, i32
  }
}

</mosaic_0001>

<bundles_post_ra>
// kernel: sbert_forward.1
= control target key start
LH: loop header
LB: loop body
LE: loop exit
PB: predicated region body
PF: predicated region fallthrough
CT: control target
= control target key end

     0   :  { %v1975_v0 = vmov 0   ;;  %v1976_v8 = vmov 0.0   ;;  %v30_v20 = vlaneseq  ;;  %vm76_vm0 = vcmask 523264   ;;  %s1978_s20 = smov 96   ;;  %s1979_s7 = smov 64   ;;  %s2534_s0 = inlined_call_operand.vmem [shape: s32[48,1], index: 0, kind: input, shape index: {}]   ;;  %s2535_s1 = inlined_call_operand.vmem [shape: f32[64,32], index: 1, kind: input, shape index: {}]   ;;  %s2536_s2 = inlined_call_operand.vmem [shape: f32[48,32], index: 2, kind: input, shape index: {}]   ;;  %s2537_s4 = inlined_call_operand.vmem [shape: bf16[32,512], index: 4, kind: input, shape index: {}]   ;;  %s2538_s5 = inlined_call_operand.vmem [shape: f32[10,128], index: 5, kind: input, shape index: {}]   ;;  %s2539_s3 = inlined_call_operand.vmem [shape: f32[48,48], index: 3, kind: input, shape index: {}]   ;;  %s2540_s6 = inlined_call_operand.vmem [shape: f32[6,32], index: 6, kind: output, shape index: {}]  }
   0x1   :  { %1870 = vset.pattern.permute.xlu1 %v1975_v0  ;;  %1869 = vset.pattern.permute.xlu0 %v1975_v0  ;;  %v26_v1 = vld [vmem:[%s2534_s0 + $0x10] sm:$0xff]  ;;  %v24_v2 = vld [vmem:[%s2534_s0] sm:$0xff]  ;;  %v27_v3 = vld [vmem:[%s2534_s0 + $0x18] sm:$0xff]  ;;  %vm216_vm7 = vcmask 261120   ;;  %vm1977_vm8 = vmmov 0   ;;  %vm419_vm9 = vcmask 130048  }
   0x2   :  { %39 = vperm.xlu1 %1870, %v26_v1   ;;  %33 = vperm.xlu0 %1869, %v24_v2   ;;  %v25_v4 = vld [vmem:[%s2534_s0 + $0x8] sm:$0xff]  ;;  %v62_v5 = vld [vmem:[%s2535_s1] sm:$0xff]  ;;  %v64_v7 = vld [vmem:[%s2535_s1 + $0x10] sm:$0xff]  ;;  %v31_v21 = vand.u32 127, %v30_v20  ;;  %vm507_vm10 = vcmask 392192   ;;  %s1981_s8 = smov 112  }
   0x3   :  { %v63_v6 = vld [vmem:[%s2535_s1 + $0x8] sm:$0xff]  ;;  %1697 = vmatprep.subr.bf16.mxu1 %v1976_v8  ;;  %v65_v10 = vld [vmem:[%s2535_s1 + $0x18] sm:$0xff]  ;;  %v66_v12 = vld [vmem:[%s2535_s1 + $0x20] sm:$0xff]  ;;  %1701 = vmatprep.mubr.msk.bf16.mxu1 %vm1977_vm8, %v1976_v8  ;;  %s1982_s9 = smov 48   ;;  %vm1544_vm14 = vcmask 1040384   ;;  %vm1546_vm15 = vcmask 1041408  }
   0x4   :  { %v1845_v9 = vpack.c.bf16 %v63_v6, %v62_v5  ;;  %v1849_v11 = vpack.c.bf16 %v65_v10, %v64_v7  ;;  %v67_v13 = vld [vmem:[%s2535_s1 + $0x28] sm:$0xff]  ;;  %v28_v15 = vld [vmem:[%s2534_s0 + $0x20] sm:$0xff]  ;;  %v68_v17 = vld [vmem:[%s2535_s1 + $0x30] sm:$0xff] }
   0x5   :  { %v29_v14 = vld [vmem:[%s2534_s0 + $0x28] sm:$0xff]  ;;  %v1853_v16 = vpack.c.bf16 %v67_v13, %v66_v12  ;;  %v69_v18 = vld [vmem:[%s2535_s1 + $0x38] sm:$0xff]  ;;  %v70_v35 = vld [vmem:[%s2536_s2] sm:$0xff] }
   0x6   :  { %42 = vperm.xlu1 %1870, %v27_v3   ;;  %36 = vperm.xlu0 %1869, %v25_v4   ;;  %v1857_v19 = vpack.c.bf16 %v69_v18, %v68_v17  ;;  %v71_v34 = vld [vmem:[%s2536_s2 + $0x8] sm:$0xff]  ;;  %v72_v41 = vld [vmem:[%s2536_s2 + $0x10] sm:$0xff]  ;;  %v73_v44 = vld [vmem:[%s2536_s2 + $0x18] sm:$0xff] }
   0x7   :  { %1846 = vmatprep.subr.bf16.mxu0 %v1845_v9  ;;  %v74_v47 = vld [vmem:[%s2536_s2 + $0x20] sm:$0xff]  ;;  %v75_v51 = vld [vmem:[%s2536_s2 + $0x28] sm:$0xff] }
   0x8   :  { %1848 = vmatpush3.bf16.msra.mxu0 %v1845_v9 }
   0x9   :  { %1850 = vmatprep.subr.bf16.mxu0 %v1849_v11 }
   0xa   :  { %48 = vperm.xlu1 %1870, %v29_v14   ;;  %45 = vperm.xlu0 %1869, %v28_v15  }
   0xc   :  { %1852 = vmatpush3.bf16.msra.mxu0 %v1849_v11 }
   0xd   :  { %1854 = vmatprep.subr.bf16.mxu0 %v1853_v16 }
  0x10   :  { %1856 = vmatpush3.bf16.msra.mxu0 %v1853_v16 }
  0x11   :  { %1858 = vmatprep.subr.bf16.mxu0 %v1857_v19 }
  0x14   :  { %1860 = vmatpush3.bf16.msra.mxu0 %v1857_v19 }
  0x15   :  { %1731 = vmatprep.subr.bf16.mxu0 %v1976_v8 }
  0x81   :  { %v40_v22 = vpop.permute.xlu1 %39  ;;  %v34_v23 = vpop.permute.xlu0 %33 }
  0x82   :  { %vm50_vm1 = vcmp.eq.s32.totalorder %v31_v21, %v34_v23  ;;  %vm52_vm2 = vcmp.eq.s32.totalorder %v31_v21, %v40_v22 }
  0x83   :  { %v56_v24 = vsel %vm50_vm1, 1.0, %v1976_v8  ;;  %v58_v27 = vsel %vm52_vm2, 1.0, %v1976_v8  ;;  %vm1550_vm1 = vcmask 1043456   ;;  %vm1552_vm2 = vcmask 1044480  }
  0x84   :  { %1688 = vmatprep.mubr.msk.f32.mxu0 %vm76_vm0, %v56_v24 }
  0x85   :  { %v43_v25 = vpop.permute.xlu1 %42  ;;  %v37_v26 = vpop.permute.xlu0 %36 }
  0x86   :  { %vm51_vm3 = vcmp.eq.s32.totalorder %v31_v21, %v37_v26  ;;  %vm53_vm4 = vcmp.eq.s32.totalorder %v31_v21, %v43_v25  ;;  %v1871_v26 = vld [vmem:[%s2537_s4] ss:$16 sps:$4 sm:$0xff]  }
  0x87   :  { %v57_v28 = vsel %vm51_vm3, 1.0, %v1976_v8  ;;  %v59_v31 = vsel %vm53_vm4, 1.0, %v1976_v8  ;;  %1698 = vmatpush3.bf16.msra.mxu1 %v1871_v26  ;;  %vm1554_vm3 = vcmask 259072  }
  0x88   :  { %1689 = vmatmul.mubr.msk.f32.vlgmr.msra.gmra.mrb[0].mxu0 %vm76_vm0, %v57_v28  ;;  %1699 = vmatprep.subr.bf16.mxu1 %v1976_v8 }
  0x89   :  { %v49_v29 = vpop.permute.xlu1 %48  ;;  %1691 = vmatprep.mubr.msk.f32.mxu0 %vm76_vm0, %v58_v27  ;;  %v46_v30 = vpop.permute.xlu0 %45  ;;  %v1872_v27 = vld [vmem:[%s2537_s4 + $0x20] ss:$16 sps:$4 sm:$0xff]  }
  0x8a   :  { %vm54_vm5 = vcmp.eq.s32.totalorder %v31_v21, %v46_v30  ;;  %vm55_vm6 = vcmp.eq.s32.totalorder %v31_v21, %v49_v29 }
  0x8b   :  { %v60_v32 = vsel %vm54_vm5, 1.0, %v1976_v8  ;;  %v61_v33 = vsel %vm55_vm6, 1.0, %v1976_v8  ;;  %1700 = vmatpush3.bf16.msra.mxu1 %v1872_v27 }
  0x8c   :  { %1692 = vmatmul.mubr.msk.f32.gmra.mrb[2].mxu0 %vm76_vm0, %v59_v31  ;;  %1713 = vmatprep.subr.bf16.mxu1 %v1976_v8 }
  0x8d   :  { %1694 = vmatprep.mubr.msk.f32.mxu0 %vm76_vm0, %v60_v32 }
  0x90   :  { %1695 = vmatmul.mubr.msk.f32.gmra.mrb[4].mxu0 %vm76_vm0, %v61_v33 }
  0x91   :  { %1737 = vmatprep.mubr.msk.bf16.mxu0 %vm1977_vm8, %v1976_v8 }
 0x15b   :  { %v1690_v36 = vpop.f32.mrb[0].mxu0 }
 0x15c   :  { %v167_v37 = vadd.f32 %v1690_v36, %v71_v34  ;;  %v161_v38 = vpop.f32.mrb[1].mxu0 }
 0x15d   :  { %v162_v39 = vadd.f32 %v161_v38, %v70_v35 }
 0x15e   :  { %v220_v40 = vsel %vm216_vm7, %v167_v37, 0.0 }
 0x15f   :  { %221 = vadd.xlane.f32.xlu1 %v220_v40  ;;  %v1693_v42 = vpop.f32.mrb[2].mxu0  ;;  %v217_v43 = vsel %vm216_vm7, %v162_v39, 0.0 }
 0x160   :  { %v171_v45 = vpop.f32.mrb[3].mxu0  ;;  %218 = vadd.xlane.f32.xlu0 %v217_v43  ;;  %v177_v48 = vadd.f32 %v1693_v42, %v73_v44 }
 0x161   :  { %v172_v46 = vadd.f32 %v171_v45, %v72_v41 }
 0x162   :  { %v226_v55 = vsel %vm216_vm7, %v177_v48, 0.0 }
 0x163   :  { %v1696_v49 = vpop.f32.mrb[4].mxu0  ;;  %v223_v50 = vsel %vm216_vm7, %v172_v46, 0.0 }
 0x164   :  { %224 = vadd.xlane.f32.xlu0 %v223_v50  ;;  %v181_v52 = vpop.f32.mrb[5].mxu0  ;;  %v187_v54 = vadd.f32 %v1696_v49, %v75_v51  ;;  %v1567_v51 = vld [vmem:[%s2538_s5 + $0x5] ss:$0 sm:$0xff] }
 0x165   :  { %v182_v53 = vadd.f32 %v181_v52, %v74_v47 }
 0x166   :  { %v232_v57 = vsel %vm216_vm7, %v187_v54, 0.0 }
 0x167   :  { %v229_v56 = vsel %vm216_vm7, %v182_v53, 0.0 }
 0x168   :  { %227 = vadd.xlane.f32.xlu0 %v226_v55  ;;  %230 = vadd.xlane.f32.xlu1 %v229_v56 }
 0x16c   :  { %233 = vadd.xlane.f32.xlu0 %v232_v57 }
 0x1ec   :  { %v222_v58 = vpop.xlane.xlu1 %221 }
 0x1ed   :  { %v237_v59 = vmul.f32 0.03125, %v222_v58  ;;  %v219_v60 = vpop.xlane.xlu0 %218 }
 0x1ee   :  { %v236_v61 = vmul.f32 0.03125, %v219_v60 }
 0x1ef   :  { %v2099_v62 = vsub.f32 %v167_v37, %v237_v59 }
 0x1f0   :  { %v2101_v63 = vsub.f32 %v162_v39, %v236_v61 }
 0x1f1   :  { %v225_v0 = vpop.xlane.xlu0 %224  ;;  %v249_v1 = vmul.f32 %v2099_v62, %v2099_v62 }
 0x1f2   :  { %v238_v2 = vmul.f32 0.03125, %v225_v0  ;;  %v248_v3 = vmul.f32 %v2101_v63, %v2101_v63 }
 0x1f3   :  { %v257_v4 = vsel %vm216_vm7, %v249_v1, 0.0 }
 0x1f4   :  { %v2108_v5 = vsub.f32 %v172_v46, %v238_v2  ;;  %258 = vadd.xlane.f32.xlu0 %v257_v4  ;;  %v254_v6 = vsel %vm216_vm7, %v248_v3, 0.0  ;;  %v1566_v46 = vld [vmem:[%s2538_s5 + $0x4] ss:$0 sm:$0xff] }
 0x1f5   :  { %v231_v7 = vpop.xlane.xlu1 %230  ;;  %255 = vadd.xlane.f32.xlu1 %v254_v6  ;;  %v228_v9 = vpop.xlane.xlu0 %227 }
 0x1f6   :  { %v240_v10 = vmul.f32 0.03125, %v231_v7  ;;  %v239_v11 = vmul.f32 0.03125, %v228_v9  ;;  %v250_v12 = vmul.f32 %v2108_v5, %v2108_v5 }
 0x1f8   :  { %v2113_v13 = vsub.f32 %v182_v53, %v240_v10  ;;  %v2115_v14 = vsub.f32 %v177_v48, %v239_v11  ;;  %v260_v15 = vsel %vm216_vm7, %v250_v12, 0.0  ;;  %v1568_v12 = vld [vmem:[%s2538_s5] ss:$0 sm:$0xff] }
 0x1f9   :  { %261 = vadd.xlane.f32.xlu1 %v260_v15  ;;  %v234_v16 = vpop.xlane.xlu0 %233 }
 0x1fa   :  { %v241_v17 = vmul.f32 0.03125, %v234_v16  ;;  %v252_v18 = vmul.f32 %v2113_v13, %v2113_v13  ;;  %v251_v19 = vmul.f32 %v2115_v14, %v2115_v14 }
 0x1fc   :  { %v2122_v21 = vsub.f32 %v187_v54, %v241_v17  ;;  %v266_v22 = vsel %vm216_vm7, %v252_v18, 0.0  ;;  %v263_v23 = vsel %vm216_vm7, %v251_v19, 0.0 }
 0x1fd   :  { %267 = vadd.xlane.f32.xlu1 %v266_v22  ;;  %264 = vadd.xlane.f32.xlu0 %v263_v23 }
 0x1fe   :  { %v253_v24 = vmul.f32 %v2122_v21, %v2122_v21 }
 0x200   :  { %v269_v25 = vsel %vm216_vm7, %v253_v24, 0.0 }
 0x201   :  { %270 = vadd.xlane.f32.xlu0 %v269_v25 }
 0x281   :  { %v259_v28 = vpop.xlane.xlu0 %258 }
 0x282   :  { %v273_v29 = vmul.f32 0.03125, %v259_v28  ;;  %v256_v30 = vpop.xlane.xlu1 %255 }
 0x283   :  { %v272_v31 = vmul.f32 0.03125, %v256_v30 }
 0x284   :  { %v279_v32 = vadd.f32 1e-12, %v273_v29 }
 0x285   :  { %v278_v33 = vadd.f32 1e-12, %v272_v31 }
 0x286   :  { %1879 = vrsqrt.f32 %v279_v32  ;;  %v262_v34 = vpop.xlane.xlu1 %261 }
 0x287   :  { %1881 = vrsqrt.f32 %v278_v33  ;;  %v274_v35 = vmul.f32 0.03125, %v262_v34 }
 0x289   :  { %v280_v36 = vadd.f32 1e-12, %v274_v35 }
 0x28a   :  { %v268_v37 = vpop.xlane.xlu1 %267  ;;  %v265_v38 = vpop.xlane.xlu0 %264 }
 0x28b   :  { %1883 = vrsqrt.f32 %v280_v36  ;;  %v276_v39 = vmul.f32 0.03125, %v268_v37  ;;  %v275_v40 = vmul.f32 0.03125, %v265_v38 }
 0x28d   :  { %v281_v41 = vadd.f32 1e-12, %v275_v40  ;;  %v282_v42 = vadd.f32 1e-12, %v276_v39 }
 0x28e   :  { %v271_v43 = vpop.xlane.xlu0 %270 }
 0x28f   :  { %v277_v44 = vmul.f32 0.03125, %v271_v43  ;;  %1885 = vrsqrt.f32 %v281_v41 }
 0x290   :  { %v1880_v45 = vpop.eup %1879  ;;  %1887 = vrsqrt.f32 %v282_v42  ;;  %v2213_v42 = vld [vmem:[%s2539_s3] sm:$0xff] }
 0x291   :  { %v1882_v47 = vpop.eup %1881  ;;  %v291_v48 = vmul.f32 %v1880_v45, %v2099_v62  ;;  %v283_v49 = vadd.f32 1e-12, %v277_v44 }
 0x292   :  { %v290_v50 = vmul.f32 %v1882_v47, %v2101_v63 }
 0x293   :  { %1889 = vrsqrt.f32 %v283_v49  ;;  %v301_v52 = vmul.f32 %v1566_v46, %v291_v48 }
 0x294   :  { %v300_v53 = vmul.f32 %v1566_v46, %v290_v50 }
 0x295   :  { %v1884_v54 = vpop.eup %1883  ;;  %v2149_v55 = vadd.f32 %v1567_v51, %v301_v52 }
 0x296   :  { %v2151_v56 = vadd.f32 %v1567_v51, %v300_v53  ;;  %v292_v57 = vmul.f32 %v1884_v54, %v2108_v5  ;;  %v2227_v54 = vld [vmem:[%s2539_s3 + $0x10] sm:$0xff] }
 0x298   :  { %v316_v58 = vpack.c.bf16 %v2149_v55, %v2151_v56  ;;  %v302_v61 = vmul.f32 %v1566_v46, %v292_v57 }
 0x299   :  { %v1886_v59 = vpop.eup %1885 }
 0x29a   :  { %1702 = vmatmul.mubr.msk.bf16.vlgmr.msra.gmra.mrb[0].mxu1 %vm216_vm7, %v316_v58  ;;  %v293_v60 = vmul.f32 %v1886_v59, %v2115_v14  ;;  %v1888_v62 = vpop.eup %1887  ;;  %v2162_v3 = vadd.f32 %v1567_v51, %v302_v61 }
 0x29b   :  { %1705 = vmatprep.mubr.msk.bf16.mxu1 %vm1977_vm8, %v1976_v8  ;;  %v294_v2 = vmul.f32 %v1888_v62, %v2113_v13 }
 0x29c   :  { %v303_v0 = vmul.f32 %v1566_v46, %v293_v60  ;;  %v2232_v60 = vld [vmem:[%s2539_s3 + $0x18] sm:$0xff] }
 0x29d   :  { %v1890_v63 = vpop.eup %1889  ;;  %v304_v7 = vmul.f32 %v1566_v46, %v294_v2 }
 0x29e   :  { %v295_v1 = vmul.f32 %v1890_v63, %v2122_v21  ;;  %v2164_v4 = vadd.f32 %v1567_v51, %v303_v0 }
 0x29f   :  { %v2173_v10 = vadd.f32 %v1567_v51, %v304_v7 }
 0x2a0   :  { %v317_v5 = vpack.c.bf16 %v2164_v4, %v2162_v3  ;;  %v305_v6 = vmul.f32 %v1566_v46, %v295_v1  ;;  %v2218_v46 = vld [vmem:[%s2539_s3 + $0x8] sm:$0xff] }
 0x2a2   :  { %1706 = vmatmul.mubr.msk.bf16.gmra.mrb[4].mxu1 %vm216_vm7, %v317_v5  ;;  %v2171_v9 = vadd.f32 %v1567_v51, %v305_v6  ;;  %v2241_v6 = vld [vmem:[%s2539_s3 + $0x20] sm:$0xff] }
 0x2a3   :  { %1709 = vmatprep.mubr.msk.bf16.mxu1 %vm1977_vm8, %v1976_v8 }
 0x2a4   :  { %v318_v11 = vpack.c.bf16 %v2171_v9, %v2173_v10 }
 0x2aa   :  { %1710 = vmatmul.mubr.msk.bf16.gmra.mrb[8].mxu1 %vm216_vm7, %v318_v11 }
 0x2ab   :  { %1719 = vmatprep.mubr.msk.bf16.mxu1 %vm1977_vm8, %v1976_v8 }
 0x36d   :  { %v378_v13 = vpop.f32.mrb[0].mxu1 }
 0x36e   :  { %v1703_v14 = vpop.f32.mrb[1].mxu1  ;;  %v379_v16 = vadd.f32 %v1568_v12, %v378_v13  ;;  %v2246_v13 = vld [vmem:[%s2539_s3 + $0x28] sm:$0xff]  ;;  %s1980_s3 = smov 80  }
 0x36f   :  { %v381_v15 = vpop.f32.mrb[2].mxu1 }
 0x370   :  { %v382_v17 = vadd.f32 %v1568_v12, %v381_v15  ;;  %v1704_v18 = vpop.f32.mrb[3].mxu1 }
 0x372   :  { %v2183_v19 = vpack.c.bf16 %v382_v17, %v379_v16 }
 0x374   :  { %413 = vrot.lane.b32.xlu1 %v2183_v19, %s1978_s20 }
 0x375   :  { %v386_v21 = vpop.f32.mrb[4].mxu1 }
 0x376   :  { %v1707_v22 = vpop.f32.mrb[5].mxu1  ;;  %v387_v24 = vadd.f32 %v1568_v12, %v386_v21 }
 0x377   :  { %v389_v23 = vpop.f32.mrb[6].mxu1 }
 0x378   :  { %v390_v25 = vadd.f32 %v1568_v12, %v389_v23  ;;  %v1708_v26 = vpop.f32.mrb[7].mxu1 }
 0x37a   :  { %v2186_v27 = vpack.c.bf16 %v390_v25, %v387_v24 }
 0x37c   :  { %415 = vrot.lane.b32.xlu0 %v2186_v27, %s1978_s20 }
 0x37d   :  { %v394_v28 = vpop.f32.mrb[8].mxu1 }
 0x37e   :  { %v1711_v29 = vpop.f32.mrb[9].mxu1  ;;  %v395_v31 = vadd.f32 %v1568_v12, %v394_v28 }
 0x37f   :  { %v397_v30 = vpop.f32.mrb[10].mxu1 }
 0x380   :  { %v398_v32 = vadd.f32 %v1568_v12, %v397_v30  ;;  %v1712_v33 = vpop.f32.mrb[11].mxu1 }
 0x382   :  { %v2189_v34 = vpack.c.bf16 %v398_v32, %v395_v31 }
 0x384   :  { %417 = vrot.lane.b32.xlu1 %v2189_v34, %s1978_s20 }
 0x3e6   :  { %v414_v35 = vpop.permute.xlu1 %413 }
 0x3e7   :  { %v430_v36 = vsel %vm419_vm9, %v414_v35, 0 }
 0x3e8   :  { %1714 = vmatpush3.bf16.xpose.msra.mxu1 %v430_v36 }
 0x3e9   :  { %1715 = vmatprep.subr.bf16.mxu1 %v1976_v8 }
 0x3ee   :  { %v416_v37 = vpop.permute.xlu0 %415 }
 0x3ef   :  { %v433_v38 = vsel %vm419_vm9, %v416_v37, 0 }
 0x3f0   :  { %1716 = vmatpush3.bf16.xpose.msra.mxu1 %v433_v38 }
 0x3f1   :  { %1717 = vmatprep.subr.bf16.mxu1 %v1976_v8 }
 0x3f6   :  { %v418_v39 = vpop.permute.xlu1 %417 }
 0x3f7   :  { %v436_v40 = vsel %vm419_vm9, %v418_v39, 0 }
 0x3f8   :  { %1718 = vmatpush3.bf16.xpose.msra.mxu1 %v436_v40 }
 0x3f9   :  { %1767 = vmatprep.subr.bf16.mxu1 %v1976_v8 }
 0x3ff   :  { %1720 = vmatmul.mubr.msk.bf16.vlgmr.msra.gmra.mrb[12].mxu1 %vm419_vm9, %v2183_v19 }
 0x400   :  { %1723 = vmatprep.mubr.msk.bf16.mxu1 %vm1977_vm8, %v1976_v8 }
 0x407   :  { %1724 = vmatmul.mubr.msk.bf16.gmra.mrb[16].mxu1 %vm419_vm9, %v2186_v27 }
 0x408   :  { %1727 = vmatprep.mubr.msk.bf16.mxu1 %vm1977_vm8, %v1976_v8 }
 0x40f   :  { %1728 = vmatmul.mubr.msk.bf16.gmra.mrb[20].mxu1 %vm419_vm9, %v2189_v34 }
 0x410   :  { %1773 = vmatprep.mubr.msk.bf16.mxu1 %vm1977_vm8, %v1976_v8 }
 0x4d2   :  { %v472_v41 = vpop.f32.mrb[12].mxu1 }
 0x4d3   :  { %v495_v43 = vmul.f32 0.25, %v472_v41  ;;  %v1721_v44 = vpop.f32.mrb[13].mxu1 }
 0x4d4   :  { %v475_v45 = vpop.f32.mrb[14].mxu1 }
 0x4d5   :  { %v496_v47 = vmul.f32 0.25, %v475_v45  ;;  %v1722_v48 = vpop.f32.mrb[15].mxu1  ;;  %v501_v49 = vadd.f32 %v495_v43, %v2213_v42 }
 0x4d7   :  { %v508_v50 = vsel %vm507_vm10, %v501_v49, -inf  ;;  %v502_v51 = vadd.f32 %v496_v47, %v2218_v46 }
 0x4d8   :  { %509 = vmax.xlane.f32.xlu1 %v508_v50 }
 0x4d9   :  { %v511_v52 = vsel %vm507_vm10, %v502_v51, -inf }
 0x4da   :  { %512 = vmax.xlane.f32.xlu0 %v511_v52  ;;  %v480_v53 = vpop.f32.mrb[16].mxu1 }
 0x4db   :  { %v497_v57 = vmul.f32 0.25, %v480_v53  ;;  %v1725_v58 = vpop.f32.mrb[17].mxu1 }
 0x4dc   :  { %v483_v59 = vpop.f32.mrb[18].mxu1 }
 0x4dd   :  { %v498_v61 = vmul.f32 0.25, %v483_v59  ;;  %v1726_v62 = vpop.f32.mrb[19].mxu1  ;;  %v503_v63 = vadd.f32 %v497_v57, %v2227_v54 }
 0x4df   :  { %v514_v0 = vsel %vm507_vm10, %v503_v63, -inf  ;;  %v504_v1 = vadd.f32 %v498_v61, %v2232_v60 }
 0x4e0   :  { %515 = vmax.xlane.f32.xlu0 %v514_v0 }
 0x4e1   :  { %v517_v2 = vsel %vm507_vm10, %v504_v1, -inf }
 0x4e2   :  { %518 = vmax.xlane.f32.xlu1 %v517_v2  ;;  %v488_v5 = vpop.f32.mrb[20].mxu1 }
 0x4e3   :  { %v499_v7 = vmul.f32 0.25, %v488_v5  ;;  %v1729_v11 = vpop.f32.mrb[21].mxu1 }
 0x4e4   :  { %v491_v12 = vpop.f32.mrb[22].mxu1 }
 0x4e5   :  { %v500_v14 = vmul.f32 0.25, %v491_v12  ;;  %v1730_v15 = vpop.f32.mrb[23].mxu1  ;;  %v505_v16 = vadd.f32 %v499_v7, %v2241_v6 }
 0x4e7   :  { %v520_v17 = vsel %vm507_vm10, %v505_v16, -inf  ;;  %v506_v18 = vadd.f32 %v500_v14, %v2246_v13 }
 0x4e8   :  { %521 = vmax.xlane.f32.xlu0 %v520_v17 }
 0x4e9   :  { %v523_v21 = vsel %vm507_vm10, %v506_v18, -inf }
 0x4ea   :  { %524 = vmax.xlane.f32.xlu1 %v523_v21 }
 0x4fb   :  { %579 = vrot.lane.b32.xlu1 %v2186_v27, %s1979_s7 }
 0x4fe   :  { %577 = vrot.lane.b32.xlu0 %v2183_v19, %s1979_s7 }
 0x502   :  { %581 = vrot.lane.b32.xlu0 %v2189_v34, %s1979_s7 }
 0x565   :  { %v510_v22 = vpop.xlane.xlu1 %509 }
 0x566   :  { %v526_v23 = vsub.f32 %v501_v49, %v510_v22 }
 0x567   :  { %v513_v24 = vpop.xlane.xlu0 %512 }
 0x568   :  { %v532_v25 = vmul.f32 1.442695, %v526_v23  ;;  %v527_v26 = vsub.f32 %v502_v51, %v513_v24 }
 0x56a   :  { %1891 = vpow2.f32 %v532_v25  ;;  %v534_v28 = vmul.f32 1.442695, %v527_v26 }
 0x56c   :  { %1893 = vpow2.f32 %v534_v28 }
 0x56d   :  { %v516_v29 = vpop.xlane.xlu0 %515 }
 0x56e   :  { %v528_v30 = vsub.f32 %v503_v63, %v516_v29 }
 0x56f   :  { %v519_v31 = vpop.xlane.xlu1 %518 }
 0x570   :  { %v536_v32 = vmul.f32 1.442695, %v528_v30  ;;  %v529_v33 = vsub.f32 %v504_v1, %v519_v31 }
 0x572   :  { %1895 = vpow2.f32 %v536_v32  ;;  %v538_v35 = vmul.f32 1.442695, %v529_v33 }
 0x574   :  { %v1892_v36 = vpop.eup %1891  ;;  %1897 = vpow2.f32 %v538_v35 }
 0x575   :  { %v522_v37 = vpop.xlane.xlu0 %521  ;;  %v544_v38 = vsel %vm507_vm10, %v1892_v36, 0.0 }
 0x576   :  { %v1894_v39 = vpop.eup %1893  ;;  %v530_v40 = vsub.f32 %v505_v16, %v522_v37  ;;  %545 = vadd.xlane.f32.xlu0 %v544_v38 }
 0x577   :  { %v525_v41 = vpop.xlane.xlu1 %524  ;;  %v547_v43 = vsel %vm507_vm10, %v1894_v39, 0.0 }
 0x578   :  { %v540_v44 = vmul.f32 1.442695, %v530_v40  ;;  %v531_v45 = vsub.f32 %v506_v18, %v525_v41  ;;  %548 = vadd.xlane.f32.xlu1 %v547_v43 }
 0x579   :  { %v578_v47 = vpop.permute.xlu0 %577 }
 0x57a   :  { %1899 = vpow2.f32 %v540_v44  ;;  %v542_v48 = vmul.f32 1.442695, %v531_v45  ;;  %1732 = vmatpush3.bf16.msra.mxu0 %v578_v47 }
 0x57b   :  { %1733 = vmatprep.subr.bf16.mxu0 %v1976_v8  ;;  %v580_v50 = vpop.permute.xlu1 %579 }
 0x57c   :  { %v1896_v49 = vpop.eup %1895  ;;  %1901 = vpow2.f32 %v542_v48 }
 0x57d   :  { %v550_v51 = vsel %vm507_vm10, %v1896_v49, 0.0  ;;  %v582_v57 = vpop.permute.xlu0 %581 }
 0x57e   :  { %v1898_v52 = vpop.eup %1897  ;;  %551 = vadd.xlane.f32.xlu0 %v550_v51  ;;  %1734 = vmatpush3.bf16.msra.mxu0 %v580_v50 }
 0x57f   :  { %v553_v53 = vsel %vm507_vm10, %v1898_v52, 0.0  ;;  %1735 = vmatprep.subr.bf16.mxu0 %v1976_v8 }
 0x580   :  { %554 = vadd.xlane.f32.xlu1 %v553_v53 }
 0x582   :  { %1736 = vmatpush3.bf16.msra.mxu0 %v582_v57 }
 0x583   :  { %1749 = vmatprep.subr.bf16.mxu0 %v1976_v8 }
 0x584   :  { %v1900_v58 = vpop.eup %1899 }
 0x585   :  { %v556_v59 = vsel %vm507_vm10, %v1900_v58, 0.0 }
 0x586   :  { %v1902_v61 = vpop.eup %1901  ;;  %557 = vadd.xlane.f32.xlu1 %v556_v59 }
 0x587   :  { %v559_v62 = vsel %vm507_vm10, %v1902_v61, 0.0 }
 0x58a   :  { %560 = vadd.xlane.f32.xlu1 %v559_v62 }
 0x594   :  { %661 = vrot.lane.b32.xlu0 %v2183_v19, %s1980_s3 }
 0x598   :  { %665 = vrot.lane.b32.xlu0 %v2189_v34, %s1980_s3 }
 0x59b   :  { %663 = vrot.lane.b32.xlu1 %v2186_v27, %s1980_s3 }
 0x59c   :  { %657 = vrot.lane.b32.xlu0 %v2186_v27, %s1981_s8 }
 0x59f   :  { %655 = vrot.lane.b32.xlu1 %v2183_v19, %s1981_s8 }
 0x5a3   :  { %659 = vrot.lane.b32.xlu1 %v2189_v34, %s1981_s8 }
 0x603   :  { %v546_v63 = vpop.xlane.xlu0 %545 }
 0x604   :  { %1903 = vrcp.f32 %v546_v63 }
 0x605   :  { %v549_v0 = vpop.xlane.xlu1 %548 }
 0x606   :  { %1905 = vrcp.f32 %v549_v0 }
 0x60b   :  { %v552_v1 = vpop.xlane.xlu0 %551 }
 0x60c   :  { %1907 = vrcp.f32 %v552_v1 }
 0x60d   :  { %v555_v2 = vpop.xlane.xlu1 %554 }
 0x60e   :  { %v1904_v5 = vpop.eup %1903  ;;  %1909 = vrcp.f32 %v555_v2 }
 0x60f   :  { %v563_v11 = vmul.f32 %v1904_v5, %v1892_v36  ;;  %v662_v14 = vpop.permute.xlu0 %661 }
 0x610   :  { %v1906_v7 = vpop.eup %1905  ;;  %v677_v17 = vsel %vm419_vm9, %v662_v14, 0 }
 0x611   :  { %v565_v12 = vmul.f32 %v1906_v7, %v1894_v39 }
 0x613   :  { %v574_v15 = vpack.c.bf16 %v565_v12, %v563_v11  ;;  %v558_v16 = vpop.xlane.xlu1 %557  ;;  %v666_v31 = vpop.permute.xlu0 %665 }
 0x614   :  { %1911 = vrcp.f32 %v558_v16  ;;  %v683_v35 = vsel %vm419_vm9, %v666_v31, 0 }
 0x615   :  { %1738 = vmatmul.mubr.msk.bf16.vlgmr.msra.gmra.mrb[8].mxu0 %vm507_vm10, %v574_v15 }
 0x616   :  { %v1908_v18 = vpop.eup %1907  ;;  %1750 = vmatpush3.bf16.xpose.msra.mxu0 %v677_v17  ;;  %1741 = vmatprep.mubr.msk.bf16.mxu0 %vm1977_vm8, %v1976_v8 }
 0x617   :  { %v561_v21 = vpop.xlane.xlu1 %560  ;;  %1751 = vmatprep.subr.bf16.mxu0 %v1976_v8  ;;  %v567_v23 = vmul.f32 %v1908_v18, %v1896_v49  ;;  %v658_v38 = vpop.permute.xlu0 %657 }
 0x618   :  { %v1910_v22 = vpop.eup %1909  ;;  %1913 = vrcp.f32 %v561_v21 }
 0x619   :  { %v569_v24 = vmul.f32 %v1910_v22, %v1898_v52 }
 0x61b   :  { %v664_v25 = vpop.permute.xlu1 %663  ;;  %v575_v26 = vpack.c.bf16 %v569_v24, %v567_v23 }
 0x61c   :  { %v680_v28 = vsel %vm419_vm9, %v664_v25, 0 }
 0x61d   :  { %1742 = vmatmul.mubr.msk.bf16.gmra.mrb[12].mxu0 %vm507_vm10, %v575_v26 }
 0x61e   :  { %1752 = vmatpush3.bf16.xpose.msra.mxu0 %v680_v28  ;;  %1745 = vmatprep.mubr.msk.bf16.mxu0 %vm1977_vm8, %v1976_v8  ;;  %v1912_v29 = vpop.eup %1911 }
 0x61f   :  { %1753 = vmatprep.subr.bf16.mxu0 %v1976_v8  ;;  %v571_v32 = vmul.f32 %v1912_v29, %v1900_v58  ;;  %v656_v37 = vpop.permute.xlu1 %655 }
 0x622   :  { %v1914_v30 = vpop.eup %1913 }
 0x623   :  { %v573_v33 = vmul.f32 %v1914_v30, %v1902_v61  ;;  %v660_v39 = vpop.permute.xlu1 %659 }
 0x625   :  { %v576_v36 = vpack.c.bf16 %v573_v33, %v571_v32 }
 0x626   :  { %1754 = vmatpush3.bf16.xpose.msra.mxu0 %v683_v35 }
 0x627   :  { %1746 = vmatmul.mubr.msk.bf16.gmra.mrb[16].mxu0 %vm507_vm10, %v576_v36  ;;  %1785 = vmatprep.subr.bf16.mxu0 %v1976_v8 }
 0x628   :  { %1755 = vmatprep.mubr.msk.bf16.mxu0 %vm1977_vm8, %v1976_v8 }
 0x62f   :  { %1756 = vmatmul.mubr.msk.bf16.vlgmr.msra.gmra.mrb[20].mxu0 %vm419_vm9, %v656_v37 }
 0x630   :  { %1759 = vmatprep.mubr.msk.bf16.mxu0 %vm1977_vm8, %v1976_v8 }
 0x637   :  { %1760 = vmatmul.mubr.msk.bf16.gmra.mrb[24].mxu0 %vm419_vm9, %v658_v38 }
 0x638   :  { %1763 = vmatprep.mubr.msk.bf16.mxu0 %vm1977_vm8, %v1976_v8 }
 0x63f   :  { %1764 = vmatmul.mubr.msk.bf16.gmra.mrb[28].mxu0 %vm419_vm9, %v660_v39 }
 0x640   :  { %1787 = vmatprep.mubr.msk.bf16.mxu0 %vm1977_vm8, %v1976_v8 }
 0x6e8   :  { %v2294_v40 = vpop.f32.mrb[8].mxu0 }
 0x6e9   :  { %v1739_v41 = vpop.f32.mrb[9].mxu0 }
 0x6ea   :  { %v2296_v43 = vpop.f32.mrb[10].mxu0 }
 0x6eb   :  { %v652_v44 = vpack.c.bf16 %v2296_v43, %v2294_v40  ;;  %v1740_v45 = vpop.f32.mrb[11].mxu0 }
 0x6f0   :  { %v2300_v47 = vpop.f32.mrb[12].mxu0 }
 0x6f1   :  { %v1743_v48 = vpop.f32.mrb[13].mxu0 }
 0x6f2   :  { %v2302_v49 = vpop.f32.mrb[14].mxu0 }
 0x6f3   :  { %v653_v50 = vpack.c.bf16 %v2302_v49, %v2300_v47  ;;  %v1744_v51 = vpop.f32.mrb[15].mxu0 }
 0x6fa   :  { %v2306_v52 = vpop.f32.mrb[16].mxu0 }
 0x6fb   :  { %v1747_v53 = vpop.f32.mrb[17].mxu0 }
 0x6fc   :  { %v2308_v57 = vpop.f32.mrb[18].mxu0 }
 0x6fd   :  { %v654_v58 = vpack.c.bf16 %v2308_v57, %v2306_v52  ;;  %v1748_v59 = vpop.f32.mrb[19].mxu0 }
 0x702   :  { %v719_v61 = vpop.f32.mrb[20].mxu0 }
 0x703   :  { %v742_v62 = vmul.f32 0.25, %v719_v61  ;;  %v1757_v63 = vpop.f32.mrb[21].mxu0 }
 0x704   :  { %v722_v0 = vpop.f32.mrb[22].mxu0 }
 0x705   :  { %v743_v1 = vmul.f32 0.25, %v722_v0  ;;  %v1758_v2 = vpop.f32.mrb[23].mxu0  ;;  %v748_v5 = vadd.f32 %v742_v62, %v2213_v42 }
 0x707   :  { %v754_v7 = vsel %vm507_vm10, %v748_v5, -inf  ;;  %v749_v11 = vadd.f32 %v743_v1, %v2218_v46 }
 0x708   :  { %755 = vmax.xlane.f32.xlu0 %v754_v7 }
 0x709   :  { %v757_v12 = vsel %vm507_vm10, %v749_v11, -inf }
 0x70a   :  { %758 = vmax.xlane.f32.xlu1 %v757_v12  ;;  %v727_v14 = vpop.f32.mrb[24].mxu0 }
 0x70b   :  { %v744_v15 = vmul.f32 0.25, %v727_v14  ;;  %v1761_v16 = vpop.f32.mrb[25].mxu0 }
 0x70c   :  { %v730_v17 = vpop.f32.mrb[26].mxu0 }
 0x70d   :  { %v745_v18 = vmul.f32 0.25, %v730_v17  ;;  %v1762_v21 = vpop.f32.mrb[27].mxu0  ;;  %v750_v22 = vadd.f32 %v744_v15, %v2227_v54 }
 0x70f   :  { %v760_v23 = vsel %vm507_vm10, %v750_v22, -inf  ;;  %v751_v42 = vadd.f32 %v745_v18, %v2232_v60 }
 0x710   :  { %761 = vmax.xlane.f32.xlu0 %v760_v23 }
 0x711   :  { %v763_v26 = vsel %vm507_vm10, %v751_v42, -inf }
 0x712   :  { %v735_v24 = vpop.f32.mrb[28].mxu0 }
 0x713   :  { %v746_v25 = vmul.f32 0.25, %v735_v24  ;;  %v1765_v46 = vpop.f32.mrb[29].mxu0 }
 0x714   :  { %764 = vmax.xlane.f32.xlu0 %v763_v26  ;;  %v738_v28 = vpop.f32.mrb[30].mxu0 }
 0x715   :  { %v747_v29 = vmul.f32 0.25, %v738_v28  ;;  %v1766_v30 = vpop.f32.mrb[31].mxu0  ;;  %v752_v31 = vadd.f32 %v746_v25, %v2241_v6 }
 0x717   :  { %v766_v32 = vsel %vm507_vm10, %v752_v31, -inf  ;;  %v753_v54 = vadd.f32 %v747_v29, %v2246_v13 }
 0x718   :  { %767 = vmax.xlane.f32.xlu1 %v766_v32  ;;  %v1873_v32 = vld [vmem:[%s2537_s4 + $0x4] ss:$16 sps:$4 sm:$0xff]  }
 0x719   :  { %v769_v33 = vsel %vm507_vm10, %v753_v54, -inf }
 0x71a   :  { %770 = vmax.xlane.f32.xlu0 %v769_v33 }
 0x729   :  { %823 = vrot.lane.b32.xlu1 %v2183_v19, %s1982_s9 }
 0x795   :  { %v756_v60 = vpop.xlane.xlu0 %755 }
 0x796   :  { %v772_v35 = vsub.f32 %v748_v5, %v756_v60 }
 0x797   :  { %v759_v36 = vpop.xlane.xlu1 %758 }
 0x798   :  { %v778_v37 = vmul.f32 1.442695, %v772_v35  ;;  %v773_v38 = vsub.f32 %v749_v11, %v759_v36 }
 0x79a   :  { %1915 = vpow2.f32 %v778_v37  ;;  %v780_v39 = vmul.f32 1.442695, %v773_v38 }
 0x79c   :  { %1917 = vpow2.f32 %v780_v39 }
 0x79d   :  { %v762_v6 = vpop.xlane.xlu0 %761 }
 0x79e   :  { %v774_v41 = vsub.f32 %v750_v22, %v762_v6  ;;  %v1874_v22 = vld [vmem:[%s2537_s4 + $0x24] ss:$16 sps:$4 sm:$0xff]  }
 0x79f   :  { %1786 = vmatpush3.bf16.msra.mxu0 %v1874_v22 }
 0x7a0   :  { %v782_v45 = vmul.f32 1.442695, %v774_v41  ;;  %1813 = vmatprep.subr.bf16.mxu0 %v1976_v8 }
 0x7a1   :  { %v765_v13 = vpop.xlane.xlu0 %764 }
 0x7a2   :  { %1919 = vpow2.f32 %v782_v45  ;;  %v775_v48 = vsub.f32 %v751_v42, %v765_v13 }
 0x7a4   :  { %v1916_v51 = vpop.eup %1915  ;;  %v784_v53 = vmul.f32 1.442695, %v775_v48 }
 0x7a5   :  { %v768_v59 = vpop.xlane.xlu1 %767  ;;  %v790_v61 = vsel %vm507_vm10, %v1916_v51, 0.0 }
 0x7a6   :  { %v1918_v19 = vpop.eup %1917  ;;  %1921 = vpow2.f32 %v784_v53  ;;  %v776_v62 = vsub.f32 %v752_v31, %v768_v59  ;;  %791 = vadd.xlane.f32.xlu1 %v790_v61 }
 0x7a7   :  { %v771_v63 = vpop.xlane.xlu0 %770  ;;  %v793_v0 = vsel %vm507_vm10, %v1918_v19, 0.0 }
 0x7a8   :  { %v786_v1 = vmul.f32 1.442695, %v776_v62  ;;  %v777_v2 = vsub.f32 %v753_v54, %v771_v63  ;;  %794 = vadd.xlane.f32.xlu0 %v793_v0 }
 0x7a9   :  { %v824_v5 = vpop.permute.xlu1 %823 }
 0x7aa   :  { %1923 = vpow2.f32 %v786_v1  ;;  %v788_v7 = vmul.f32 1.442695, %v777_v2  ;;  %1768 = vmatpush3.bf16.msra.mxu1 %v824_v5 }
 0x7ab   :  { %1769 = vmatprep.subr.bf16.mxu1 %v1976_v8 }
 0x7ac   :  { %v1920_v11 = vpop.eup %1919  ;;  %1925 = vpow2.f32 %v788_v7 }
 0x7ad   :  { %v796_v12 = vsel %vm507_vm10, %v1920_v11, 0.0 }
 0x7ae   :  { %797 = vadd.xlane.f32.xlu1 %v796_v12 }
 0x7b0   :  { %v1922_v14 = vpop.eup %1921 }
 0x7b1   :  { %v799_v15 = vsel %vm507_vm10, %v1922_v14, 0.0 }
 0x7b2   :  { %800 = vadd.xlane.f32.xlu0 %v799_v15 }
 0x7b4   :  { %v1924_v16 = vpop.eup %1923 }
 0x7b5   :  { %v802_v17 = vsel %vm507_vm10, %v1924_v16, 0.0 }
 0x7b6   :  { %v1926_v18 = vpop.eup %1925  ;;  %803 = vadd.xlane.f32.xlu1 %v802_v17 }
 0x7b7   :  { %v805_v21 = vsel %vm507_vm10, %v1926_v18, 0.0 }
 0x7b8   :  { %806 = vadd.xlane.f32.xlu0 %v805_v21 }
 0x7c7   :  { %827 = vrot.lane.b32.xlu1 %v2189_v34, %s1982_s9 }
 0x7ce   :  { %825 = vrot.lane.b32.xlu0 %v2186_v27, %s1982_s9 }
 0x833   :  { %v792_v42 = vpop.xlane.xlu1 %791 }
 0x835   :  { %v795_v23 = vpop.xlane.xlu0 %794 }
 0x836   :  { %1927 = vrcp.f32 %v795_v23 }
 0x837   :  { %1929 = vrcp.f32 %v792_v42 }
 0x83b   :  { %v798_v25 = vpop.xlane.xlu1 %797 }
 0x83f   :  { %v801_v24 = vpop.xlane.xlu0 %800 }
 0x840   :  { %1931 = vrcp.f32 %v801_v24  ;;  %v1928_v34 = vpop.eup %1927 }
 0x841   :  { %1933 = vrcp.f32 %v798_v25  ;;  %v1930_v27 = vpop.eup %1929  ;;  %v811_v29 = vmul.f32 %v1928_v34, %v1918_v19 }
 0x842   :  { %v809_v30 = vmul.f32 %v1930_v27, %v1916_v51 }
 0x843   :  { %v804_v26 = vpop.xlane.xlu1 %803 }
 0x844   :  { %v820_v54 = vpack.c.bf16 %v811_v29, %v809_v30 }
 0x845   :  { %v807_v46 = vpop.xlane.xlu0 %806 }
 0x846   :  { %1935 = vrcp.f32 %v807_v46 }
 0x847   :  { %v828_v31 = vpop.permute.xlu1 %827  ;;  %1937 = vrcp.f32 %v804_v26 }
 0x849   :  { %v826_v28 = vpop.permute.xlu0 %825 }
 0x84a   :  { %1770 = vmatpush3.bf16.msra.mxu1 %v826_v28  ;;  %v1932_v33 = vpop.eup %1931 }
 0x84b   :  { %1771 = vmatprep.subr.bf16.mxu1 %v1976_v8  ;;  %v1934_v60 = vpop.eup %1933  ;;  %v815_v35 = vmul.f32 %v1932_v33, %v1922_v14 }
 0x84c   :  { %v813_v36 = vmul.f32 %v1934_v60, %v1920_v11 }
 0x84e   :  { %1772 = vmatpush3.bf16.msra.mxu1 %v828_v31  ;;  %v821_v37 = vpack.c.bf16 %v815_v35, %v813_v36 }
 0x84f   :  { %1799 = vmatprep.subr.bf16.mxu1 %v1976_v8 }
 0x850   :  { %v1936_v38 = vpop.eup %1935 }
 0x851   :  { %1774 = vmatmul.mubr.msk.bf16.vlgmr.msra.gmra.mrb[24].mxu1 %vm507_vm10, %v820_v54  ;;  %v1938_v39 = vpop.eup %1937  ;;  %v819_v6 = vmul.f32 %v1936_v38, %v1926_v18 }
 0x852   :  { %1777 = vmatprep.mubr.msk.bf16.mxu1 %vm1977_vm8, %v1976_v8  ;;  %1800 = vmatpush3.bf16.msra.mxu1 %v1873_v32  ;;  %v817_v41 = vmul.f32 %v1938_v39, %v1924_v16  ;;  %v1594_v16 = vld [vmem:[%s2538_s5 + $0x1] ss:$0 sm:$0xff] }
 0x853   :  { %1829 = vmatprep.subr.bf16.mxu1 %v1976_v8 }
 0x854   :  { %v822_v45 = vpack.c.bf16 %v819_v6, %v817_v41 }
 0x859   :  { %1778 = vmatmul.mubr.msk.bf16.gmra.mrb[28].mxu1 %vm507_vm10, %v821_v37 }
 0x85a   :  { %1781 = vmatprep.mubr.msk.bf16.mxu1 %vm1977_vm8, %v1976_v8 }
 0x861   :  { %1782 = vmatmul.mubr.msk.bf16.gmra.mrb[32].mxu1 %vm507_vm10, %v822_v45 }
 0x862   :  { %1801 = vmatprep.mubr.msk.bf16.mxu1 %vm1977_vm8, %v1976_v8 }
 0x869   :  { %1802 = vmatmul.mubr.msk.bf16.vlgmr.msra.gmra.mrb[36].mxu1 %vm419_vm9, %v652_v44 }
 0x86a   :  { %1805 = vmatprep.mubr.msk.bf16.mxu1 %vm1977_vm8, %v1976_v8 }
 0x871   :  { %1806 = vmatmul.mubr.msk.bf16.gmra.mrb[40].mxu1 %vm419_vm9, %v653_v50 }
 0x872   :  { %1809 = vmatprep.mubr.msk.bf16.mxu1 %vm1977_vm8, %v1976_v8 }
 0x879   :  { %1810 = vmatmul.mubr.msk.bf16.gmra.mrb[44].mxu1 %vm419_vm9, %v654_v58 }
 0x87a   :  { %1833 = vmatprep.mubr.msk.bf16.mxu1 %vm1977_vm8, %v1976_v8 }
 0x924   :  { %v875_v40 = vpop.f32.mrb[24].mxu1 }
 0x925   :  { %v1775_v43 = vpop.f32.mrb[25].mxu1 }
 0x926   :  { %v878_v44 = vpop.f32.mrb[26].mxu1 }
 0x927   :  { %v898_v13 = vpack.c.bf16 %v878_v44, %v875_v40  ;;  %v1776_v48 = vpop.f32.mrb[27].mxu1 }
 0x929   :  { %1788 = vmatmul.mubr.msk.bf16.vlgmr.msra.gmra.mrb[32].mxu0 %vm419_vm9, %v898_v13 }
 0x92a   :  { %1791 = vmatprep.mubr.msk.bf16.mxu0 %vm1977_vm8, %v1976_v8 }
 0x92c   :  { %v883_v47 = vpop.f32.mrb[28].mxu1 }
 0x92d   :  { %v1779_v49 = vpop.f32.mrb[29].mxu1 }
 0x92e   :  { %v886_v50 = vpop.f32.mrb[30].mxu1 }
 0x92f   :  { %v899_v51 = vpack.c.bf16 %v886_v50, %v883_v47  ;;  %v1780_v52 = vpop.f32.mrb[31].mxu1 }
 0x931   :  { %1792 = vmatmul.mubr.msk.bf16.gmra.mrb[36].mxu0 %vm419_vm9, %v899_v51 }
 0x932   :  { %1795 = vmatprep.mubr.msk.bf16.mxu0 %vm1977_vm8, %v1976_v8 }
 0x934   :  { %v891_v57 = vpop.f32.mrb[32].mxu1 }
 0x935   :  { %v1783_v58 = vpop.f32.mrb[33].mxu1 }
 0x936   :  { %v894_v53 = vpop.f32.mrb[34].mxu1 }
 0x937   :  { %v900_v59 = vpack.c.bf16 %v894_v53, %v891_v57  ;;  %v1784_v61 = vpop.f32.mrb[35].mxu1 }
 0x939   :  { %1796 = vmatmul.mubr.msk.bf16.gmra.mrb[40].mxu0 %vm419_vm9, %v900_v59 }
 0x93a   :  { %1817 = vmatprep.mubr.msk.bf16.mxu0 %vm1977_vm8, %v1976_v8 }
 0x93c   :  { %v1022_v19 = vpop.f32.mrb[36].mxu1 }
 0x93d   :  { %v1803_v62 = vpop.f32.mrb[37].mxu1 }
 0x93e   :  { %v1025_v63 = vpop.f32.mrb[38].mxu1 }
 0x93f   :  { %v1804_v0 = vpop.f32.mrb[39].mxu1 }
 0x944   :  { %v1030_v1 = vpop.f32.mrb[40].mxu1 }
 0x945   :  { %v1807_v2 = vpop.f32.mrb[41].mxu1 }
 0x946   :  { %v1033_v5 = vpop.f32.mrb[42].mxu1 }
 0x947   :  { %v1808_v7 = vpop.f32.mrb[43].mxu1 }
 0x94c   :  { %v1038_v11 = vpop.f32.mrb[44].mxu1 }
 0x94d   :  { %v1811_v12 = vpop.f32.mrb[45].mxu1 }
 0x94e   :  { %v1041_v14 = vpop.f32.mrb[46].mxu1 }
 0x94f   :  { %v1812_v15 = vpop.f32.mrb[47].mxu1 }
 0x9fc   :  { %v950_v17 = vpop.f32.mrb[32].mxu0 }
 0x9fd   :  { %v1023_v18 = vadd.f32 %v1022_v19, %v950_v17  ;;  %v1789_v21 = vpop.f32.mrb[33].mxu0 }
 0x9fe   :  { %v953_v22 = vpop.f32.mrb[34].mxu0 }
 0x9ff   :  { %v1049_v23 = vadd.f32 %v1594_v16, %v1023_v18  ;;  %v1026_v42 = vadd.f32 %v1025_v63, %v953_v22  ;;  %v1790_v24 = vpop.f32.mrb[35].mxu0 }
 0xa01   :  { %v1050_v25 = vadd.f32 %v1594_v16, %v1026_v42  ;;  %v1055_v46 = vadd.f32 %v1049_v23, %v2151_v56  ;;  %v1875_v23 = vld [vmem:[%s2537_s4 + $0x8] ss:$16 sps:$4 sm:$0xff]  }
 0xa02   :  { %1814 = vmatpush3.bf16.msra.mxu0 %v1875_v23  ;;  %v1876_v42 = vld [vmem:[%s2537_s4 + $0x28] ss:$16 sps:$4 sm:$0xff]  }
 0xa03   :  { %v1061_v26 = vsel %vm216_vm7, %v1055_v46, 0.0  ;;  %v1056_v34 = vadd.f32 %v1050_v25, %v2149_v55  ;;  %1815 = vmatprep.subr.bf16.mxu0 %v1976_v8 }
 0xa04   :  { %v958_v28 = vpop.f32.mrb[36].mxu0  ;;  %1062 = vadd.xlane.f32.xlu1 %v1061_v26 }
 0xa05   :  { %v1031_v27 = vadd.f32 %v1030_v1, %v958_v28  ;;  %v1793_v29 = vpop.f32.mrb[37].mxu0  ;;  %v1064_v30 = vsel %vm216_vm7, %v1056_v34, 0.0 }
 0xa06   :  { %v961_v31 = vpop.f32.mrb[38].mxu0  ;;  %1065 = vadd.xlane.f32.xlu0 %v1064_v30  ;;  %1816 = vmatpush3.bf16.msra.mxu0 %v1876_v42 }
 0xa07   :  { %v1051_v32 = vadd.f32 %v1594_v16, %v1031_v27  ;;  %v1034_v54 = vadd.f32 %v1033_v5, %v961_v31  ;;  %v1794_v33 = vpop.f32.mrb[39].mxu0 }
 0xa09   :  { %v1052_v60 = vadd.f32 %v1594_v16, %v1034_v54  ;;  %v1057_v35 = vadd.f32 %v1051_v32, %v2162_v3 }
 0xa0b   :  { %v1067_v56 = vsel %vm216_vm7, %v1057_v35, 0.0  ;;  %v1058_v36 = vadd.f32 %v1052_v60, %v2164_v4  ;;  %v1595_v60 = vld [vmem:[%s2538_s5 + $0x6] ss:$0 sm:$0xff] }
 0xa0c   :  { %v966_v37 = vpop.f32.mrb[40].mxu0  ;;  %1068 = vadd.xlane.f32.xlu0 %v1067_v56 }
 0xa0d   :  { %v1039_v55 = vadd.f32 %v1038_v11, %v966_v37  ;;  %v1797_v38 = vpop.f32.mrb[41].mxu0  ;;  %v1070_v39 = vsel %vm216_vm7, %v1058_v36, 0.0 }
 0xa0e   :  { %v969_v6 = vpop.f32.mrb[42].mxu0  ;;  %1071 = vadd.xlane.f32.xlu1 %v1070_v39 }
 0xa0f   :  { %v1053_v41 = vadd.f32 %v1594_v16, %v1039_v55  ;;  %v1042_v45 = vadd.f32 %v1041_v14, %v969_v6  ;;  %v1798_v40 = vpop.f32.mrb[43].mxu0  ;;  %v1596_v6 = vld [vmem:[%s2538_s5 + $0x7] ss:$0 sm:$0xff] }
 0xa11   :  { %v1054_v43 = vadd.f32 %v1594_v16, %v1042_v45  ;;  %v1059_v44 = vadd.f32 %v1053_v41, %v2173_v10 }
 0xa13   :  { %v1073_v3 = vsel %vm216_vm7, %v1059_v44, 0.0  ;;  %v1060_v13 = vadd.f32 %v1054_v43, %v2171_v9 }
 0xa14   :  { %1074 = vadd.xlane.f32.xlu0 %v1073_v3 }
 0xa15   :  { %v1076_v4 = vsel %vm216_vm7, %v1060_v13, 0.0 }
 0xa16   :  { %1077 = vadd.xlane.f32.xlu1 %v1076_v4 }
 0xa91   :  { %v1063_v48 = vpop.xlane.xlu1 %1062 }
 0xa92   :  { %v1079_v47 = vmul.f32 0.03125, %v1063_v48 }
 0xa93   :  { %v1066_v49 = vpop.xlane.xlu0 %1065 }
 0xa94   :  { %v1085_v50 = vsub.f32 %v1055_v46, %v1079_v47  ;;  %v1080_v51 = vmul.f32 0.03125, %v1066_v49 }
 0xa96   :  { %v1086_v52 = vsub.f32 %v1056_v34, %v1080_v51  ;;  %v1091_v57 = vmul.f32 %v1085_v50, %v1085_v50 }
 0xa98   :  { %v1097_v58 = vsel %vm216_vm7, %v1091_v57, 0.0  ;;  %v1092_v53 = vmul.f32 %v1086_v52, %v1086_v52 }
 0xa99   :  { %v1069_v59 = vpop.xlane.xlu0 %1068  ;;  %1098 = vadd.xlane.f32.xlu0 %v1097_v58 }
 0xa9a   :  { %v1081_v10 = vmul.f32 0.03125, %v1069_v59  ;;  %v1100_v61 = vsel %vm216_vm7, %v1092_v53, 0.0 }
 0xa9b   :  { %v1072_v9 = vpop.xlane.xlu1 %1071  ;;  %1101 = vadd.xlane.f32.xlu1 %v1100_v61 }
 0xa9c   :  { %v1087_v19 = vsub.f32 %v1057_v35, %v1081_v10  ;;  %v1082_v62 = vmul.f32 0.03125, %v1072_v9 }
 0xa9e   :  { %v1088_v63 = vsub.f32 %v1058_v36, %v1082_v62  ;;  %v1093_v0 = vmul.f32 %v1087_v19, %v1087_v19 }
 0xaa0   :  { %v1103_v1 = vsel %vm216_vm7, %v1093_v0, 0.0  ;;  %v1094_v2 = vmul.f32 %v1088_v63, %v1088_v63 }
 0xaa1   :  { %1104 = vadd.xlane.f32.xlu0 %v1103_v1  ;;  %v1075_v5 = vpop.xlane.xlu0 %1074  ;;  %v1877_v1 = vld [vmem:[%s2537_s4 + $0xc] ss:$16 sps:$4 sm:$0xff]  }
 0xaa2   :  { %v1083_v7 = vmul.f32 0.03125, %v1075_v5  ;;  %v1106_v11 = vsel %vm216_vm7, %v1094_v2, 0.0  ;;  %v1325_v2 = vsel %vm76_vm0, %v1877_v1, 0  ;;  %v1878_v5 = vld [vmem:[%s2537_s4 + $0x2c] ss:$16 sps:$4 sm:$0xff]  }
 0xaa3   :  { %1107 = vadd.xlane.f32.xlu1 %v1106_v11  ;;  %v1078_v12 = vpop.xlane.xlu1 %1077  ;;  %1830 = vmatpush3.bf16.xpose.msra.mxu1 %v1325_v2  ;;  %v1597_v11 = vld [vmem:[%s2538_s5 + $0x2] ss:$0 sm:$0xff] }
 0xaa4   :  { %v1089_v14 = vsub.f32 %v1059_v44, %v1083_v7  ;;  %v1084_v15 = vmul.f32 0.03125, %v1078_v12  ;;  %1831 = vmatprep.subr.bf16.mxu1 %v1976_v8  ;;  %v1328_v7 = vsel %vm76_vm0, %v1878_v5, 0 }
 0xaa6   :  { %v1090_v16 = vsub.f32 %v1060_v13, %v1084_v15  ;;  %v1095_v17 = vmul.f32 %v1089_v14, %v1089_v14 }
 0xaa8   :  { %v1109_v18 = vsel %vm216_vm7, %v1095_v17, 0.0  ;;  %v1096_v21 = vmul.f32 %v1090_v16, %v1090_v16 }
 0xaa9   :  { %1110 = vadd.xlane.f32.xlu0 %v1109_v18 }
 0xaaa   :  { %v1112_v22 = vsel %vm216_vm7, %v1096_v21, 0.0 }
 0xaab   :  { %1113 = vadd.xlane.f32.xlu1 %v1112_v22  ;;  %1832 = vmatpush3.bf16.xpose.msra.mxu1 %v1328_v7 }
 0xb26   :  { %v1099_v24 = vpop.xlane.xlu0 %1098 }
 0xb27   :  { %v1115_v25 = vmul.f32 0.03125, %v1099_v24 }
 0xb28   :  { %v1102_v46 = vpop.xlane.xlu1 %1101 }
 0xb29   :  { %v1121_v26 = vadd.f32 1e-12, %v1115_v25  ;;  %v1116_v34 = vmul.f32 0.03125, %v1102_v46 }
 0xb2b   :  { %1939 = vrsqrt.f32 %v1121_v26  ;;  %v1122_v28 = vadd.f32 1e-12, %v1116_v34 }
 0xb2d   :  { %1941 = vrsqrt.f32 %v1122_v28 }
 0xb2e   :  { %v1105_v27 = vpop.xlane.xlu0 %1104 }
 0xb2f   :  { %v1117_v29 = vmul.f32 0.03125, %v1105_v27 }
 0xb30   :  { %v1108_v30 = vpop.xlane.xlu1 %1107 }
 0xb31   :  { %v1123_v31 = vadd.f32 1e-12, %v1117_v29  ;;  %v1118_v32 = vmul.f32 0.03125, %v1108_v30 }
 0xb33   :  { %1943 = vrsqrt.f32 %v1123_v31  ;;  %v1124_v54 = vadd.f32 1e-12, %v1118_v32 }
 0xb35   :  { %v1940_v33 = vpop.eup %1939  ;;  %1945 = vrsqrt.f32 %v1124_v54 }
 0xb36   :  { %v1133_v35 = vmul.f32 %v1940_v33, %v1085_v50  ;;  %v1111_v56 = vpop.xlane.xlu0 %1110 }
 0xb37   :  { %v1942_v36 = vpop.eup %1941  ;;  %v1119_v37 = vmul.f32 0.03125, %v1111_v56 }
 0xb38   :  { %v1143_v55 = vmul.f32 %v1595_v60, %v1133_v35  ;;  %v1134_v38 = vmul.f32 %v1942_v36, %v1086_v52  ;;  %v1114_v39 = vpop.xlane.xlu1 %1113 }
 0xb39   :  { %v1125_v41 = vadd.f32 1e-12, %v1119_v37  ;;  %v1120_v45 = vmul.f32 0.03125, %v1114_v39 }
 0xb3a   :  { %v1144_v40 = vmul.f32 %v1595_v60, %v1134_v38  ;;  %v2417_v44 = vadd.f32 %v1596_v6, %v1143_v55 }
 0xb3b   :  { %1947 = vrsqrt.f32 %v1125_v41  ;;  %v1126_v43 = vadd.f32 1e-12, %v1120_v45 }
 0xb3c   :  { %v2419_v3 = vadd.f32 %v1596_v6, %v1144_v40 }
 0xb3d   :  { %v1944_v13 = vpop.eup %1943  ;;  %1949 = vrsqrt.f32 %v1126_v43 }
 0xb3e   :  { %v1135_v4 = vmul.f32 %v1944_v13, %v1087_v19  ;;  %v1159_v48 = vpack.c.bf16 %v2419_v3, %v2417_v44 }
 0xb3f   :  { %v1946_v47 = vpop.eup %1945 }
 0xb40   :  { %v1136_v49 = vmul.f32 %v1946_v47, %v1088_v63  ;;  %1818 = vmatmul.mubr.msk.bf16.vlgmr.msra.gmra.mrb[44].mxu0 %vm216_vm7, %v1159_v48  ;;  %v1145_v50 = vmul.f32 %v1595_v60, %v1135_v4 }
 0xb41   :  { %1821 = vmatprep.mubr.msk.bf16.mxu0 %vm1977_vm8, %v1976_v8 }
 0xb42   :  { %v1146_v51 = vmul.f32 %v1595_v60, %v1136_v49  ;;  %v2426_v52 = vadd.f32 %v1596_v6, %v1145_v50 }
 0xb44   :  { %v2428_v57 = vadd.f32 %v1596_v6, %v1146_v51 }
 0xb45   :  { %v1948_v58 = vpop.eup %1947 }
 0xb46   :  { %v1137_v53 = vmul.f32 %v1948_v58, %v1089_v14  ;;  %v1160_v59 = vpack.c.bf16 %v2428_v57, %v2426_v52 }
 0xb47   :  { %v1950_v10 = vpop.eup %1949 }
 0xb48   :  { %v1138_v61 = vmul.f32 %v1950_v10, %v1090_v16  ;;  %1822 = vmatmul.mubr.msk.bf16.gmra.mrb[48].mxu0 %vm216_vm7, %v1160_v59  ;;  %v1147_v9 = vmul.f32 %v1595_v60, %v1137_v53 }
 0xb49   :  { %1825 = vmatprep.mubr.msk.bf16.mxu0 %vm1977_vm8, %v1976_v8 }
 0xb4a   :  { %v1148_v19 = vmul.f32 %v1595_v60, %v1138_v61  ;;  %v2435_v62 = vadd.f32 %v1596_v6, %v1147_v9 }
 0xb4c   :  { %v2437_v63 = vadd.f32 %v1596_v6, %v1148_v19 }
 0xb4e   :  { %v1161_v0 = vpack.c.bf16 %v2437_v63, %v2435_v62 }
 0xb50   :  { %1826 = vmatmul.mubr.msk.bf16.gmra.mrb[52].mxu0 %vm216_vm7, %v1161_v0 }
 0xc13   :  { %v1221_v12 = vpop.f32.mrb[44].mxu0 }
 0xc14   :  { %v1222_v14 = vadd.f32 %v1597_v11, %v1221_v12  ;;  %v1819_v15 = vpop.f32.mrb[45].mxu0 }
 0xc15   :  { %v1224_v16 = vpop.f32.mrb[46].mxu0 }
 0xc16   :  { %v1244_v17 = vmul.f32 %v1222_v14, %v1222_v14  ;;  %v1225_v18 = vadd.f32 %v1597_v11, %v1224_v16  ;;  %v1820_v21 = vpop.f32.mrb[47].mxu0 }
 0xc18   :  { %v1250_v22 = vmul.f32 %v1244_v17, %v1222_v14  ;;  %v1245_v23 = vmul.f32 %v1225_v18, %v1225_v18 }
 0xc1a   :  { %v1256_v42 = vmul.f32 0.044715, %v1250_v22  ;;  %v1251_v24 = vmul.f32 %v1245_v23, %v1225_v18 }
 0xc1b   :  { %v1229_v25 = vpop.f32.mrb[48].mxu0 }
 0xc1c   :  { %v1262_v46 = vadd.f32 %v1256_v42, %v1222_v14  ;;  %v1257_v26 = vmul.f32 0.044715, %v1251_v24  ;;  %v1230_v34 = vadd.f32 %v1597_v11, %v1229_v25  ;;  %v1823_v28 = vpop.f32.mrb[49].mxu0 }
 0xc1d   :  { %v1232_v27 = vpop.f32.mrb[50].mxu0 }
 0xc1e   :  { %v1268_v29 = vmul.f32 0.7978846, %v1262_v46  ;;  %v1263_v30 = vadd.f32 %v1257_v26, %v1225_v18  ;;  %v1246_v31 = vmul.f32 %v1230_v34, %v1230_v34  ;;  %v1233_v32 = vadd.f32 %v1597_v11, %v1232_v27  ;;  %v1824_v54 = vpop.f32.mrb[51].mxu0 }
 0xc20   :  { %1951 = vtanh.f32 %v1268_v29  ;;  %v1269_v33 = vmul.f32 0.7978846, %v1263_v30  ;;  %v1252_v60 = vmul.f32 %v1246_v31, %v1230_v34  ;;  %v1247_v35 = vmul.f32 %v1233_v32, %v1233_v32 }
 0xc22   :  { %1953 = vtanh.f32 %v1269_v33  ;;  %v1258_v56 = vmul.f32 0.044715, %v1252_v60  ;;  %v1253_v36 = vmul.f32 %v1247_v35, %v1233_v32 }
 0xc23   :  { %v1237_v37 = vpop.f32.mrb[52].mxu0 }
 0xc24   :  { %v1264_v55 = vadd.f32 %v1258_v56, %v1230_v34  ;;  %v1259_v38 = vmul.f32 0.044715, %v1253_v36  ;;  %v1238_v39 = vadd.f32 %v1597_v11, %v1237_v37  ;;  %v1827_v6 = vpop.f32.mrb[53].mxu0 }
 0xc25   :  { %v1240_v41 = vpop.f32.mrb[54].mxu0 }
 0xc26   :  { %v1270_v45 = vmul.f32 0.7978846, %v1264_v55  ;;  %v1265_v40 = vadd.f32 %v1259_v38, %v1233_v32  ;;  %v1248_v43 = vmul.f32 %v1238_v39, %v1238_v39  ;;  %v1241_v13 = vadd.f32 %v1597_v11, %v1240_v41  ;;  %v1828_v4 = vpop.f32.mrb[55].mxu0 }
 0xc28   :  { %1955 = vtanh.f32 %v1270_v45  ;;  %v1271_v48 = vmul.f32 0.7978846, %v1265_v40  ;;  %v1254_v47 = vmul.f32 %v1248_v43, %v1238_v39  ;;  %v1249_v49 = vmul.f32 %v1241_v13, %v1241_v13 }
 0xc2a   :  { %v1952_v50 = vpop.eup %1951  ;;  %1957 = vtanh.f32 %v1271_v48  ;;  %v1260_v51 = vmul.f32 0.044715, %v1254_v47  ;;  %v1255_v58 = vmul.f32 %v1249_v49, %v1241_v13 }
 0xc2b   :  { %v1280_v53 = vadd.f32 1.0, %v1952_v50 }
 0xc2c   :  { %v1954_v59 = vpop.eup %1953  ;;  %v1266_v10 = vadd.f32 %v1260_v51, %v1238_v39  ;;  %v1261_v61 = vmul.f32 0.044715, %v1255_v58 }
 0xc2d   :  { %v1286_v9 = vmul.f32 0.5, %v1280_v53  ;;  %v1281_v19 = vadd.f32 1.0, %v1954_v59 }
 0xc2e   :  { %v1272_v0 = vmul.f32 0.7978846, %v1266_v10  ;;  %v1267_v1 = vadd.f32 %v1261_v61, %v1241_v13 }
 0xc2f   :  { %v1287_v2 = vmul.f32 0.5, %v1281_v19  ;;  %v1292_v7 = vmul.f32 %v1286_v9, %v1222_v14 }
 0xc30   :  { %1959 = vtanh.f32 %v1272_v0  ;;  %v1273_v5 = vmul.f32 0.7978846, %v1267_v1 }
 0xc31   :  { %v1293_v11 = vmul.f32 %v1287_v2, %v1225_v18 }
 0xc32   :  { %v1956_v12 = vpop.eup %1955  ;;  %1961 = vtanh.f32 %v1273_v5 }
 0xc33   :  { %v1298_v15 = vpack.c.bf16 %v1293_v11, %v1292_v7  ;;  %v1282_v16 = vadd.f32 1.0, %v1956_v12 }
 0xc34   :  { %v1958_v17 = vpop.eup %1957 }
 0xc35   :  { %v1288_v21 = vmul.f32 0.5, %v1282_v16  ;;  %v1283_v22 = vadd.f32 1.0, %v1958_v17  ;;  %1834 = vmatmul.mubr.msk.bf16.vlgmr.msra.gmra.mrb[48].mxu1 %vm76_vm0, %v1298_v15 }
 0xc36   :  { %1837 = vmatprep.mubr.msk.bf16.mxu1 %vm1977_vm8, %v1976_v8 }
 0xc37   :  { %v1289_v23 = vmul.f32 0.5, %v1283_v22  ;;  %v1294_v42 = vmul.f32 %v1288_v21, %v1230_v34  ;;  %v1603_v34 = vld [vmem:[%s2538_s5 + $0x3] ss:$0 sm:$0xff] }
 0xc39   :  { %v1295_v24 = vmul.f32 %v1289_v23, %v1233_v32 }
 0xc3a   :  { %v1960_v25 = vpop.eup %1959 }
 0xc3b   :  { %v1284_v46 = vadd.f32 1.0, %v1960_v25  ;;  %v1299_v26 = vpack.c.bf16 %v1295_v24, %v1294_v42 }
 0xc3c   :  { %v1962_v14 = vpop.eup %1961 }
 0xc3d   :  { %v1290_v18 = vmul.f32 0.5, %v1284_v46  ;;  %v1285_v28 = vadd.f32 1.0, %v1962_v14  ;;  %1838 = vmatmul.mubr.msk.bf16.gmra.mrb[52].mxu1 %vm76_vm0, %v1299_v26 }
 0xc3e   :  { %1841 = vmatprep.mubr.msk.bf16.mxu1 %vm1977_vm8, %v1976_v8 }
 0xc3f   :  { %v1291_v27 = vmul.f32 0.5, %v1285_v28  ;;  %v1296_v29 = vmul.f32 %v1290_v18, %v1238_v39 }
 0xc41   :  { %v1297_v30 = vmul.f32 %v1291_v27, %v1241_v13 }
 0xc43   :  { %v1300_v31 = vpack.c.bf16 %v1297_v30, %v1296_v29 }
 0xc45   :  { %1842 = vmatmul.mubr.msk.bf16.gmra.mrb[56].mxu1 %vm76_vm0, %v1300_v31  ;;  %vm1548_vm0 = vcmask 1042432  }
 0xd08   :  { %v1364_v32 = vpop.f32.mrb[48].mxu1 }
 0xd09   :  { %v1365_v54 = vadd.f32 %v1603_v34, %v1364_v32  ;;  %v1835_v33 = vpop.f32.mrb[49].mxu1 }
 0xd0a   :  { %v1367_v60 = vpop.f32.mrb[50].mxu1 }
 0xd0b   :  { %v1368_v35 = vadd.f32 %v1603_v34, %v1367_v60  ;;  %v1836_v56 = vpop.f32.mrb[51].mxu1  ;;  %v1387_v36 = vadd.f32 %v1365_v54, %v2417_v44 }
 0xd0d   :  { %v1393_v8 = vsel %vm216_vm7, %v1387_v36, 0.0  ;;  %v1388_v37 = vadd.f32 %v1368_v35, %v2419_v3 }
 0xd0e   :  { %1394 = vadd.xlane.f32.xlu0 %v1393_v8 }
 0xd0f   :  { %v1396_v55 = vsel %vm216_vm7, %v1388_v37, 0.0 }
 0xd10   :  { %1397 = vadd.xlane.f32.xlu1 %v1396_v55  ;;  %v1372_v38 = vpop.f32.mrb[52].mxu1 }
 0xd11   :  { %v1373_v39 = vadd.f32 %v1603_v34, %v1372_v38  ;;  %v1839_v6 = vpop.f32.mrb[53].mxu1 }
 0xd12   :  { %v1375_v41 = vpop.f32.mrb[54].mxu1 }
 0xd13   :  { %v1376_v45 = vadd.f32 %v1603_v34, %v1375_v41  ;;  %v1840_v40 = vpop.f32.mrb[55].mxu1  ;;  %v1389_v43 = vadd.f32 %v1373_v39, %v2426_v52  ;;  %v1609_v39 = vld [vmem:[%s2538_s5 + $0x8] ss:$0 sm:$0xff] }
 0xd14   :  { %v1610_v40 = vld [vmem:[%s2538_s5 + $0x9] ss:$0 sm:$0xff] }
 0xd15   :  { %v1399_v13 = vsel %vm216_vm7, %v1389_v43, 0.0  ;;  %v1390_v44 = vadd.f32 %v1376_v45, %v2428_v57 }
 0xd16   :  { %1400 = vadd.xlane.f32.xlu0 %v1399_v13 }
 0xd17   :  { %v1402_v4 = vsel %vm216_vm7, %v1390_v44, 0.0 }
 0xd18   :  { %1403 = vadd.xlane.f32.xlu1 %v1402_v4  ;;  %v1380_v3 = vpop.f32.mrb[56].mxu1 }
 0xd19   :  { %v1381_v48 = vadd.f32 %v1603_v34, %v1380_v3  ;;  %v1843_v47 = vpop.f32.mrb[57].mxu1 }
 0xd1a   :  { %v1383_v49 = vpop.f32.mrb[58].mxu1 }
 0xd1b   :  { %v1384_v50 = vadd.f32 %v1603_v34, %v1383_v49  ;;  %v1844_v51 = vpop.f32.mrb[59].mxu1  ;;  %v1391_v58 = vadd.f32 %v1381_v48, %v2435_v62 }
 0xd1d   :  { %v1405_v53 = vsel %vm216_vm7, %v1391_v58, 0.0  ;;  %v1392_v52 = vadd.f32 %v1384_v50, %v2437_v63 }
 0xd1e   :  { %1406 = vadd.xlane.f32.xlu0 %v1405_v53 }
 0xd1f   :  { %v1408_v59 = vsel %vm216_vm7, %v1392_v52, 0.0 }
 0xd20   :  { %1409 = vadd.xlane.f32.xlu1 %v1408_v59 }
 0xd9b   :  { %v1395_v57 = vpop.xlane.xlu0 %1394 }
 0xd9c   :  { %v1411_v10 = vmul.f32 0.03125, %v1395_v57 }
 0xd9d   :  { %v1398_v61 = vpop.xlane.xlu1 %1397 }
 0xd9e   :  { %v1417_v9 = vsub.f32 %v1387_v36, %v1411_v10  ;;  %v1412_v19 = vmul.f32 0.03125, %v1398_v61 }
 0xda0   :  { %v1418_v0 = vsub.f32 %v1388_v37, %v1412_v19  ;;  %v1423_v1 = vmul.f32 %v1417_v9, %v1417_v9  ;;  %v1492_v37 = vshrl.u32 %v30_v20, 7 }
 0xda2   :  { %v1429_v2 = vsel %vm216_vm7, %v1423_v1, 0.0  ;;  %v1424_v5 = vmul.f32 %v1418_v0, %v1418_v0  ;;  %vm1493_vm11 = vcmp.ge.s32.totalorder %v1492_v37, 1  ;;  %vm1494_vm12 = vcmp.le.s32.totalorder %v1492_v37, 6 }
 0xda3   :  { %v1401_v7 = vpop.xlane.xlu0 %1400  ;;  %1430 = vadd.xlane.f32.xlu0 %v1429_v2  ;;  %vm2505_vm13 = vmand %vm1493_vm11, %vm1494_vm12 }
 0xda4   :  { %v1413_v62 = vmul.f32 0.03125, %v1401_v7  ;;  %v1432_v11 = vsel %vm216_vm7, %v1424_v5, 0.0 }
 0xda5   :  { %v1404_v63 = vpop.xlane.xlu1 %1403  ;;  %1433 = vadd.xlane.f32.xlu1 %v1432_v11 }
 0xda6   :  { %v2478_v12 = vsub.f32 %v1389_v43, %v1413_v62  ;;  %v1414_v15 = vmul.f32 0.03125, %v1404_v63 }
 0xda8   :  { %v2480_v16 = vsub.f32 %v1390_v44, %v1414_v15  ;;  %v1425_v17 = vmul.f32 %v2478_v12, %v2478_v12 }
 0xdaa   :  { %v1435_v21 = vsel %vm216_vm7, %v1425_v17, 0.0  ;;  %v1426_v22 = vmul.f32 %v2480_v16, %v2480_v16 }
 0xdab   :  { %1436 = vadd.xlane.f32.xlu0 %v1435_v21  ;;  %v1407_v23 = vpop.xlane.xlu0 %1406 }
 0xdac   :  { %v1415_v42 = vmul.f32 0.03125, %v1407_v23  ;;  %v1438_v24 = vsel %vm216_vm7, %v1426_v22, 0.0 }
 0xdad   :  { %1439 = vadd.xlane.f32.xlu1 %v1438_v24  ;;  %v1410_v25 = vpop.xlane.xlu1 %1409 }
 0xdae   :  { %v2488_v46 = vsub.f32 %v1391_v58, %v1415_v42  ;;  %v1416_v26 = vmul.f32 0.03125, %v1410_v25 }
 0xdb0   :  { %v2490_v14 = vsub.f32 %v1392_v52, %v1416_v26  ;;  %v1427_v18 = vmul.f32 %v2488_v46, %v2488_v46 }
 0xdb2   :  { %v1441_v28 = vsel %vm216_vm7, %v1427_v18, 0.0  ;;  %v1428_v27 = vmul.f32 %v2490_v14, %v2490_v14 }
 0xdb3   :  { %1442 = vadd.xlane.f32.xlu0 %v1441_v28 }
 0xdb4   :  { %v1444_v29 = vsel %vm216_vm7, %v1428_v27, 0.0 }
 0xdb5   :  { %1445 = vadd.xlane.f32.xlu1 %v1444_v29 }
 0xe30   :  { %v1431_v30 = vpop.xlane.xlu0 %1430 }
 0xe31   :  { %v1447_v31 = vmul.f32 0.03125, %v1431_v30 }
 0xe32   :  { %v1434_v34 = vpop.xlane.xlu1 %1433 }
 0xe33   :  { %v1453_v32 = vadd.f32 1e-12, %v1447_v31  ;;  %v1448_v54 = vmul.f32 0.03125, %v1434_v34 }
 0xe35   :  { %1963 = vrsqrt.f32 %v1453_v32  ;;  %v1454_v33 = vadd.f32 1e-12, %v1448_v54 }
 0xe37   :  { %1965 = vrsqrt.f32 %v1454_v33 }
 0xe38   :  { %v1437_v60 = vpop.xlane.xlu0 %1436 }
 0xe39   :  { %v1449_v35 = vmul.f32 0.03125, %v1437_v60 }
 0xe3a   :  { %v1440_v56 = vpop.xlane.xlu1 %1439 }
 0xe3b   :  { %v1455_v36 = vadd.f32 1e-12, %v1449_v35  ;;  %v1450_v8 = vmul.f32 0.03125, %v1440_v56 }
 0xe3d   :  { %1967 = vrsqrt.f32 %v1455_v36  ;;  %v1456_v55 = vadd.f32 1e-12, %v1450_v8 }
 0xe3f   :  { %v1964_v38 = vpop.eup %1963  ;;  %1969 = vrsqrt.f32 %v1456_v55 }
 0xe40   :  { %v1465_v6 = vmul.f32 %v1964_v38, %v1417_v9  ;;  %v1443_v41 = vpop.xlane.xlu0 %1442 }
 0xe41   :  { %v1966_v45 = vpop.eup %1965  ;;  %v1451_v43 = vmul.f32 0.03125, %v1443_v41 }
 0xe42   :  { %v1475_v13 = vmul.f32 %v1609_v39, %v1465_v6  ;;  %v1466_v20 = vmul.f32 %v1966_v45, %v1418_v0  ;;  %v1446_v44 = vpop.xlane.xlu1 %1445 }
 0xe43   :  { %v1457_v3 = vadd.f32 1e-12, %v1451_v43  ;;  %v1452_v48 = vmul.f32 0.03125, %v1446_v44 }
 0xe44   :  { %v1485_v47 = vadd.f32 %v1610_v40, %v1475_v13  ;;  %v1476_v49 = vmul.f32 %v1609_v39, %v1466_v20 }
 0xe45   :  { %1971 = vrsqrt.f32 %v1457_v3  ;;  %v1458_v50 = vadd.f32 1e-12, %v1452_v48 }
 0xe46   :  { %v1496_v51 = vsel %vm2505_vm13, %v1485_v47, -inf  ;;  %v1486_v58 = vadd.f32 %v1610_v40, %v1476_v49 }
 0xe47   :  { %v1968_v53 = vpop.eup %1967  ;;  %v1497_v52 = vsel %vm216_vm7, %v1496_v51, -inf  ;;  %1973 = vrsqrt.f32 %v1458_v50 }
 0xe48   :  { %v1504_v59 = vsel %vm2505_vm13, %v1486_v58, -inf  ;;  %v1467_v57 = vmul.f32 %v1968_v53, %v2478_v12  ;;  %v1498_v9 = vrot.slane %v1497_v52, 4 }
 0xe49   :  { %v1970_v10 = vpop.eup %1969  ;;  %v1505_v61 = vsel %vm216_vm7, %v1504_v59, -inf }
 0xe4a   :  { %v1506_v19 = vrot.slane %v1505_v61, 4  ;;  %v1477_v0 = vmul.f32 %v1609_v39, %v1467_v57  ;;  %v1468_v1 = vmul.f32 %v1970_v10, %v2480_v16  ;;  %v1499_v62 = vmax.f32 %v1497_v52, %v1498_v9 }
 0xe4c   :  { %v1507_v2 = vmax.f32 %v1505_v61, %v1506_v19  ;;  %v1487_v5 = vadd.f32 %v1610_v40, %v1477_v0  ;;  %v1478_v7 = vmul.f32 %v1609_v39, %v1468_v1  ;;  %v1500_v24 = vrot.slane %v1499_v62, 2 }
 0xe4e   :  { %v1512_v11 = vsel %vm2505_vm13, %v1487_v5, -inf  ;;  %v1488_v63 = vadd.f32 %v1610_v40, %v1478_v7  ;;  %v1508_v12 = vrot.slane %v1507_v2, 2  ;;  %v1501_v32 = vmax.f32 %v1499_v62, %v1500_v24 }
 0xe4f   :  { %v1972_v15 = vpop.eup %1971  ;;  %v1513_v17 = vsel %vm216_vm7, %v1512_v11, -inf }
 0xe50   :  { %v1514_v21 = vrot.slane %v1513_v17, 4  ;;  %v1520_v22 = vsel %vm2505_vm13, %v1488_v63, -inf  ;;  %v1469_v16 = vmul.f32 %v1972_v15, %v2488_v46  ;;  %v1509_v27 = vmax.f32 %v1507_v2, %v1508_v12 }
 0xe51   :  { %v1974_v23 = vpop.eup %1973  ;;  %v1521_v42 = vsel %vm216_vm7, %v1520_v22, -inf  ;;  %v1502_v55 = vrot.slane %v1501_v32, 1 }
 0xe52   :  { %v1515_v25 = vmax.f32 %v1513_v17, %v1514_v21  ;;  %v1522_v26 = vrot.slane %v1521_v42, 4  ;;  %v1479_v18 = vmul.f32 %v1609_v39, %v1469_v16  ;;  %v1470_v28 = vmul.f32 %v1974_v23, %v2490_v14 }
 0xe53   :  { %v1510_v56 = vrot.slane %v1509_v27, 1  ;;  %v1503_v20 = vmax.f32 %v1501_v32, %v1502_v55 }
 0xe54   :  { %v1516_v29 = vrot.slane %v1515_v25, 2  ;;  %v1523_v30 = vmax.f32 %v1521_v42, %v1522_v26  ;;  %v1489_v31 = vadd.f32 %v1610_v40, %v1479_v18  ;;  %v1480_v34 = vmul.f32 %v1609_v39, %v1470_v28 }
 0xe55   :  { %v1511_v41 = vmax.f32 %v1509_v27, %v1510_v56 }
 0xe56   :  { %v1517_v54 = vmax.f32 %v1515_v25, %v1516_v29  ;;  %v1524_v33 = vrot.slane %v1523_v30, 2  ;;  %v1528_v60 = vsel %vm2505_vm13, %v1489_v31, -inf  ;;  %v1490_v35 = vadd.f32 %v1610_v40, %v1480_v34 }
 0xe57   :  { %v1529_v36 = vsel %vm216_vm7, %v1528_v60, -inf  ;;  %v1545_v48 = vsel %vm1544_vm14, %v1503_v20, %v1511_v41 }
 0xe58   :  { %v1525_v46 = vmax.f32 %v1523_v30, %v1524_v33  ;;  %v1518_v8 = vrot.slane %v1517_v54, 1  ;;  %v1530_v37 = vrot.slane %v1529_v36, 4  ;;  %v1536_v14 = vsel %vm2505_vm13, %v1490_v35, -inf }
 0xe59   :  { %v1537_v38 = vsel %vm216_vm7, %v1536_v14, -inf }
 0xe5a   :  { %v1531_v39 = vmax.f32 %v1529_v36, %v1530_v37  ;;  %v1538_v6 = vrot.slane %v1537_v38, 4  ;;  %v1526_v45 = vrot.slane %v1525_v46, 1  ;;  %v1519_v43 = vmax.f32 %v1517_v54, %v1518_v8 }
 0xe5c   :  { %v1532_v13 = vrot.slane %v1531_v39, 2  ;;  %v1539_v40 = vmax.f32 %v1537_v38, %v1538_v6  ;;  %v1527_v47 = vmax.f32 %v1525_v46, %v1526_v45  ;;  %v1547_v49 = vsel %vm1546_vm15, %v1545_v48, %v1519_v43 }
 0xe5e   :  { %v1533_v44 = vmax.f32 %v1531_v39, %v1532_v13  ;;  %v1540_v3 = vrot.slane %v1539_v40, 2  ;;  %v1549_v53 = vsel %vm1548_vm0, %v1547_v49, %v1527_v47 }
 0xe60   :  { %v1534_v4 = vrot.slane %v1533_v44, 1  ;;  %v1541_v50 = vmax.f32 %v1539_v40, %v1540_v3 }
 0xe62   :  { %v1535_v51 = vmax.f32 %v1533_v44, %v1534_v4  ;;  %v1542_v58 = vrot.slane %v1541_v50, 1 }
 0xe64   :  { %v1551_v52 = vsel %vm1550_vm1, %v1549_v53, %v1535_v51  ;;  %v1543_v59 = vmax.f32 %v1541_v50, %v1542_v58 }
 0xe66   :  { %v1553_v57 = vsel %vm1552_vm2, %v1551_v52, %v1543_v59 }
 0xe67   :  { %1555 = vst.msk [vmem:[%s2540_s6] sm:$0x3f] %vm1554_vm3, %v1553_v57 }

</bundles_post_ra>
